<compile_context>
chip_gen: v5e
topology: v5e:2x2
jax: 0.10.0
libtpu: 0.0.40
codegen_flags: <defaults>
</compile_context>

<pallas_src>
import jax
import jax.numpy as jnp
from jax import lax
from jax.experimental import pallas as pl
from jax.experimental.pallas import tpu as pltpu


def _transition_up_kernel(x_ref, re_ref, ro_ref, w_ref, b_ref, o_ref):
    """One (n, h-tile) block of the fused ConvTranspose2d(2,2) + pixel shuffle.

    x_ref : (1, Cin, th, W)    NCHW input block
    re_ref: (W, 2W)            0/1 matrix placing col j at lane 2j
    ro_ref: (W, 2W)            0/1 matrix placing col j at lane 2j+1
    w_ref : (Cin*Cout*4,) f32 in SMEM (torch layout, flat)   [small-channel path]
            or (2, 2*Cout, Cin) f32 in VMEM                  [generic path]
    b_ref : (Cout,) f32 in SMEM          [small path]
            or (2*Cout, 1, 1) f32 VMEM   [generic path]
    o_ref : (1, Cout, th, 4W)  output block; last axis = [ky=0 | ky=1] x (2j+kx)
    """
    _, cin, th, w = x_ref.shape
    _, cout, _, w4 = o_ref.shape
    w2 = w4 // 2

    re = re_ref[...]
    ro = ro_ref[...]

    if len(w_ref.shape) == 1:
        # ---- small-channel path: exact f32, VPU FMAs with SMEM scalar weights ----
        xe = []   # per-channel rows upsampled onto even lanes (th, 2W)
        xo = []   # per-channel rows upsampled onto odd  lanes (th, 2W)
        for ci in range(cin):
            xc = x_ref[0, ci]                                    # (th, W)
            xhi = xc.astype(jnp.bfloat16).astype(jnp.float32)    # exact in bf16
            xlo = xc - xhi                                       # tiny residual
            xe.append(jnp.dot(xhi, re, preferred_element_type=jnp.float32)
                      + jnp.dot(xlo, re, preferred_element_type=jnp.float32))
            xo.append(jnp.dot(xhi, ro, preferred_element_type=jnp.float32)
                      + jnp.dot(xlo, ro, preferred_element_type=jnp.float32))
        for co in range(cout):
            halves = []
            for ky in range(2):
                acc = None
                for ci in range(cin):
                    base = ((ci * cout + co) * 2 + ky) * 2       # torch flat index
                    term = w_ref[base] * xe[ci] + w_ref[base + 1] * xo[ci]
                    acc = term if acc is None else acc + term
                halves.append(acc + b_ref[co])                   # bias folded here
            o_ref[0, co] = jnp.concatenate(halves, axis=-1)      # (th, 4W)
    else:
        # ---- generic path (larger channel counts): MXU contraction ----
        # (untested at the shapes in this script; kept for completeness)
        x2d = x_ref[0].reshape(cin * th, w)
        xe = jnp.dot(x2d, re, preferred_element_type=jnp.float32).reshape(cin, th, w2)
        xo = jnp.dot(x2d, ro, preferred_element_type=jnp.float32).reshape(cin, th, w2)
        pe = lax.dot_general(w_ref[0], xe, (((1,), (0,)), ((), ())),
                             preferred_element_type=jnp.float32)
        po = lax.dot_general(w_ref[1], xo, (((1,), (0,)), ((), ())),
                             preferred_element_type=jnp.float32)
        pairs = pe + po + b_ref[...]                             # (2*Cout, th, 2W)
        o_ref[0] = jnp.concatenate([pairs[:cout], pairs[cout:]], axis=-1)


def _pick_tile_rows(n, h, cin, cout, w, budget_bytes=18 * 1024 * 1024):
    """Largest legal row-tile (divides H, %8==0 or ==H) under a VMEM budget,
    keeping >= 2 grid blocks when possible (v7x megacore)."""
    r_bytes = 32 * w * w                                  # R_even + R_odd, 2x buffered
    # double-buffered in/out blocks + in-kernel temporaries, per input row (f32)
    per_row = 4 * w * (6 * cin + 8 * cout + 4)
    cands = [d for d in range(h, 0, -1) if h % d == 0 and (d % 8 == 0 or d == h)]
    budget = max(budget_bytes - r_bytes, per_row)
    th = next((d for d in cands if d * per_row <= budget), cands[-1])
    if n * (h // th) < 2:
        smaller = [d for d in cands if d < th]
        if smaller:
            th = smaller[0]
    return th


@jax.jit
def transition_up(x_nchw, weight, bias):
    """Forward of TransitionUp: ConvTranspose2d(k=2, s=2, p=0, bias). NCHW in/out.

    weight: torch layout (Cin, Cout, 2, 2); bias: (Cout,)
    """
    N, Cin, H, W = x_nchw.shape
    Cout = weight.shape[1]
    W2, W4 = 2 * W, 4 * W
    small = (Cin * Cout) <= 64

    th = _pick_tile_rows(N, H, Cin, Cout, W)
    grid = (N, H // th)

    # constant 0/1 upsample matrices: place input column j at lane 2j / 2j+1
    j = jnp.arange(W)[:, None]
    m = jnp.arange(W2)[None, :]
    r_even = (m == 2 * j).astype(jnp.float32)
    r_odd = (m == 2 * j + 1).astype(jnp.float32)

    if small:
        w_arg = weight.reshape(-1).astype(jnp.float32)            # torch flat order
        b_arg = bias.astype(jnp.float32)
        w_spec = pl.BlockSpec(memory_space=pltpu.MemorySpace.SMEM)
        b_spec = pl.BlockSpec(memory_space=pltpu.MemorySpace.SMEM)
    else:
        wt = jnp.transpose(weight, (3, 2, 1, 0))                  # (kx, ky, co, ci)
        w_arg = wt.reshape(2, 2 * Cout, Cin).astype(jnp.float32)
        b_arg = jnp.concatenate([bias, bias]).reshape(2 * Cout, 1, 1).astype(jnp.float32)
        w_spec = pl.BlockSpec((2, 2 * Cout, Cin), lambda n, h: (0, 0, 0))
        b_spec = pl.BlockSpec((2 * Cout, 1, 1), lambda n, h: (0, 0, 0))

    y = pl.pallas_call(
        _transition_up_kernel,
        out_shape=jax.ShapeDtypeStruct((N, Cout, H, W4), jnp.float32),
        grid_spec=pltpu.PrefetchScalarGridSpec(
            num_scalar_prefetch=0,
            grid=grid,
            in_specs=[
                pl.BlockSpec((1, Cin, th, W), lambda n, h: (n, 0, h, 0)),
                pl.BlockSpec((W, W2), lambda n, h: (0, 0)),
                pl.BlockSpec((W, W2), lambda n, h: (0, 0)),
                w_spec,
                b_spec,
            ],
            out_specs=pl.BlockSpec((1, Cout, th, W4), lambda n, h: (n, 0, h, 0)),
        ),
        compiler_params=pltpu.CompilerParams(
            dimension_semantics=("parallel", "parallel"),
            vmem_limit_bytes=32 * 1024 * 1024),
    )(x_nchw.astype(jnp.float32), r_even, r_odd, w_arg, b_arg)

    # (N, Cout, H, 4W) -> (N, Cout, 2H, 2W) is a free row-major reshape:
    # flat index i*4W + ky*2W + (2j+kx) == (2i+ky)*2W + (2j+kx).
    return y.reshape(N, Cout, 2 * H, 2 * W)


# ------------------------------ pure-JAX reference ------------------------------
def _ref_transition_up(x, weight, bias):
    """ConvTranspose2d(k=2, s=2, p=0) via lhs-dilated conv (HIGHEST precision)."""
    w_oihw = jnp.transpose(jnp.flip(weight, axis=(2, 3)), (1, 0, 2, 3))
    out = lax.conv_general_dilated(
        x, w_oihw, window_strides=(1, 1), padding=((1, 1), (1, 1)),
        lhs_dilation=(2, 2),
        dimension_numbers=("NCHW", "OIHW", "NCHW"),
        precision=lax.Precision.HIGHEST)
    return out + bias.reshape(1, -1, 1, 1)


if __name__ == "__main__":
    key = jax.random.PRNGKey(0)
    kx, kw, kb = jax.random.split(key, 3)

    N, in_ch, out_ch, H, W = 2, 4, 4, 16, 16
    x = jax.random.normal(kx, (N, in_ch, H, W), dtype=jnp.float32)
    weight = 0.2 * jax.random.normal(kw, (in_ch, out_ch, 2, 2), dtype=jnp.float32)
    bias = 0.1 * jax.random.normal(kb, (out_ch,), dtype=jnp.float32)

    out = transition_up(x, weight, bias)
    out = jax.block_until_ready(out)
    assert out.shape == (N, out_ch, 2 * H, 2 * W), out.shape

    ref = _ref_transition_up(x, weight, bias)
    err = float(jnp.max(jnp.abs(out - ref)))
    assert jnp.allclose(out, ref, atol=1e-4, rtol=1e-4), err

    print("KERNEL_OK")
</pallas_src>

<mosaic_0001>
module attributes {stable_mosaic.version = 11 : i64} {
  func.func @_transition_up_kernel(%arg0: i32, %arg1: i32, %arg2: memref<1x4x16x16xf32, #tpu.memory_space<vmem>>, %arg3: memref<16x32xf32, #tpu.memory_space<vmem>>, %arg4: memref<16x32xf32, #tpu.memory_space<vmem>>, %arg5: memref<64xf32, #tpu.memory_space<smem>>, %arg6: memref<4xf32, #tpu.memory_space<smem>>, %arg7: memref<1x4x16x64xf32, #tpu.memory_space<vmem>>) attributes {dimension_semantics = [#tpu.dimension_semantics<parallel>, #tpu.dimension_semantics<parallel>], iteration_bounds = array<i64: 2, 1>, scalar_prefetch = 0 : i64, scratch_operands = 0 : i64, tpu.core_type = #tpu.core_type<tc>, window_params = [{transform_indices = @transform_0, window_bounds = array<i64: 1, 4, 16, 16>}, {pipeline_mode = #tpu.pipeline_mode<synchronous>, transform_indices = @transform_1, window_bounds = array<i64: 16, 32>}, {pipeline_mode = #tpu.pipeline_mode<synchronous>, transform_indices = @transform_2, window_bounds = array<i64: 16, 32>}, {transform_indices = @transform_3, window_bounds = array<i64: 64>}, {transform_indices = @transform_4, window_bounds = array<i64: 4>}, {transform_indices = @transform_5, window_bounds = array<i64: 1, 4, 16, 64>}]} {
    %c0 = arith.constant 0 : index
    %c0_0 = arith.constant 0 : index
    %0 = vector.load %arg3[%c0, %c0_0] : memref<16x32xf32, #tpu.memory_space<vmem>>, vector<16x32xf32>
    %c0_1 = arith.constant 0 : index
    %c0_2 = arith.constant 0 : index
    %1 = vector.load %arg4[%c0_1, %c0_2] : memref<16x32xf32, #tpu.memory_space<vmem>>, vector<16x32xf32>
    %c0_3 = arith.constant 0 : index
    %c0_4 = arith.constant 0 : index
    %c0_5 = arith.constant 0 : index
    %c0_6 = arith.constant 0 : index
    %2 = vector.load %arg2[%c0_3, %c0_4, %c0_5, %c0_6] : memref<1x4x16x16xf32, #tpu.memory_space<vmem>>, vector<1x1x16x16xf32>
    %3 = vector.shape_cast %2 : vector<1x1x16x16xf32> to vector<16x16xf32>
    %4 = arith.truncf %3 : vector<16x16xf32> to vector<16x16xbf16>
    %5 = arith.extf %4 : vector<16x16xbf16> to vector<16x16xf32>
    %6 = arith.subf %3, %5 : vector<16x16xf32>
    %cst = arith.constant dense<0.000000e+00> : vector<16x32xf32>
    %7 = tpu.matmul %5, %0, %cst {dimension_numbers = #tpu.dot_dimension_numbers<[1], [0], [0], [1], [0, 0, 1, 1], [], []>} : vector<16x16xf32>, vector<16x32xf32>, vector<16x32xf32> -> vector<16x32xf32>
    %cst_7 = arith.constant dense<0.000000e+00> : vector<16x32xf32>
    %8 = tpu.matmul %6, %0, %cst_7 {dimension_numbers = #tpu.dot_dimension_numbers<[1], [0], [0], [1], [0, 0, 1, 1], [], []>} : vector<16x16xf32>, vector<16x32xf32>, vector<16x32xf32> -> vector<16x32xf32>
    %9 = arith.addf %7, %8 : vector<16x32xf32>
    %cst_8 = arith.constant dense<0.000000e+00> : vector<16x32xf32>
    %10 = tpu.matmul %5, %1, %cst_8 {dimension_numbers = #tpu.dot_dimension_numbers<[1], [0], [0], [1], [0, 0, 1, 1], [], []>} : vector<16x16xf32>, vector<16x32xf32>, vector<16x32xf32> -> vector<16x32xf32>
    %cst_9 = arith.constant dense<0.000000e+00> : vector<16x32xf32>
    %11 = tpu.matmul %6, %1, %cst_9 {dimension_numbers = #tpu.dot_dimension_numbers<[1], [0], [0], [1], [0, 0, 1, 1], [], []>} : vector<16x16xf32>, vector<16x32xf32>, vector<16x32xf32> -> vector<16x32xf32>
    %12 = arith.addf %10, %11 : vector<16x32xf32>
    %c0_10 = arith.constant 0 : index
    %c1 = arith.constant 1 : index
    %c0_11 = arith.constant 0 : index
    %c0_12 = arith.constant 0 : index
    %13 = vector.load %arg2[%c0_10, %c1, %c0_11, %c0_12] : memref<1x4x16x16xf32, #tpu.memory_space<vmem>>, vector<1x1x16x16xf32>
    %14 = vector.shape_cast %13 : vector<1x1x16x16xf32> to vector<16x16xf32>
    %15 = arith.truncf %14 : vector<16x16xf32> to vector<16x16xbf16>
    %16 = arith.extf %15 : vector<16x16xbf16> to vector<16x16xf32>
    %17 = arith.subf %14, %16 : vector<16x16xf32>
    %cst_13 = arith.constant dense<0.000000e+00> : vector<16x32xf32>
    %18 = tpu.matmul %16, %0, %cst_13 {dimension_numbers = #tpu.dot_dimension_numbers<[1], [0], [0], [1], [0, 0, 1, 1], [], []>} : vector<16x16xf32>, vector<16x32xf32>, vector<16x32xf32> -> vector<16x32xf32>
    %cst_14 = arith.constant dense<0.000000e+00> : vector<16x32xf32>
    %19 = tpu.matmul %17, %0, %cst_14 {dimension_numbers = #tpu.dot_dimension_numbers<[1], [0], [0], [1], [0, 0, 1, 1], [], []>} : vector<16x16xf32>, vector<16x32xf32>, vector<16x32xf32> -> vector<16x32xf32>
    %20 = arith.addf %18, %19 : vector<16x32xf32>
    %cst_15 = arith.constant dense<0.000000e+00> : vector<16x32xf32>
    %21 = tpu.matmul %16, %1, %cst_15 {dimension_numbers = #tpu.dot_dimension_numbers<[1], [0], [0], [1], [0, 0, 1, 1], [], []>} : vector<16x16xf32>, vector<16x32xf32>, vector<16x32xf32> -> vector<16x32xf32>
    %cst_16 = arith.constant dense<0.000000e+00> : vector<16x32xf32>
    %22 = tpu.matmul %17, %1, %cst_16 {dimension_numbers = #tpu.dot_dimension_numbers<[1], [0], [0], [1], [0, 0, 1, 1], [], []>} : vector<16x16xf32>, vector<16x32xf32>, vector<16x32xf32> -> vector<16x32xf32>
    %23 = arith.addf %21, %22 : vector<16x32xf32>
    %c0_17 = arith.constant 0 : index
    %c2 = arith.constant 2 : index
    %c0_18 = arith.constant 0 : index
    %c0_19 = arith.constant 0 : index
    %24 = vector.load %arg2[%c0_17, %c2, %c0_18, %c0_19] : memref<1x4x16x16xf32, #tpu.memory_space<vmem>>, vector<1x1x16x16xf32>
    %25 = vector.shape_cast %24 : vector<1x1x16x16xf32> to vector<16x16xf32>
    %26 = arith.truncf %25 : vector<16x16xf32> to vector<16x16xbf16>
    %27 = arith.extf %26 : vector<16x16xbf16> to vector<16x16xf32>
    %28 = arith.subf %25, %27 : vector<16x16xf32>
    %cst_20 = arith.constant dense<0.000000e+00> : vector<16x32xf32>
    %29 = tpu.matmul %27, %0, %cst_20 {dimension_numbers = #tpu.dot_dimension_numbers<[1], [0], [0], [1], [0, 0, 1, 1], [], []>} : vector<16x16xf32>, vector<16x32xf32>, vector<16x32xf32> -> vector<16x32xf32>
    %cst_21 = arith.constant dense<0.000000e+00> : vector<16x32xf32>
    %30 = tpu.matmul %28, %0, %cst_21 {dimension_numbers = #tpu.dot_dimension_numbers<[1], [0], [0], [1], [0, 0, 1, 1], [], []>} : vector<16x16xf32>, vector<16x32xf32>, vector<16x32xf32> -> vector<16x32xf32>
    %31 = arith.addf %29, %30 : vector<16x32xf32>
    %cst_22 = arith.constant dense<0.000000e+00> : vector<16x32xf32>
    %32 = tpu.matmul %27, %1, %cst_22 {dimension_numbers = #tpu.dot_dimension_numbers<[1], [0], [0], [1], [0, 0, 1, 1], [], []>} : vector<16x16xf32>, vector<16x32xf32>, vector<16x32xf32> -> vector<16x32xf32>
    %cst_23 = arith.constant dense<0.000000e+00> : vector<16x32xf32>
    %33 = tpu.matmul %28, %1, %cst_23 {dimension_numbers = #tpu.dot_dimension_numbers<[1], [0], [0], [1], [0, 0, 1, 1], [], []>} : vector<16x16xf32>, vector<16x32xf32>, vector<16x32xf32> -> vector<16x32xf32>
    %34 = arith.addf %32, %33 : vector<16x32xf32>
    %c0_24 = arith.constant 0 : index
    %c3 = arith.constant 3 : index
    %c0_25 = arith.constant 0 : index
    %c0_26 = arith.constant 0 : index
    %35 = vector.load %arg2[%c0_24, %c3, %c0_25, %c0_26] : memref<1x4x16x16xf32, #tpu.memory_space<vmem>>, vector<1x1x16x16xf32>
    %36 = vector.shape_cast %35 : vector<1x1x16x16xf32> to vector<16x16xf32>
    %37 = arith.truncf %36 : vector<16x16xf32> to vector<16x16xbf16>
    %38 = arith.extf %37 : vector<16x16xbf16> to vector<16x16xf32>
    %39 = arith.subf %36, %38 : vector<16x16xf32>
    %cst_27 = arith.constant dense<0.000000e+00> : vector<16x32xf32>
    %40 = tpu.matmul %38, %0, %cst_27 {dimension_numbers = #tpu.dot_dimension_numbers<[1], [0], [0], [1], [0, 0, 1, 1], [], []>} : vector<16x16xf32>, vector<16x32xf32>, vector<16x32xf32> -> vector<16x32xf32>
    %cst_28 = arith.constant dense<0.000000e+00> : vector<16x32xf32>
    %41 = tpu.matmul %39, %0, %cst_28 {dimension_numbers = #tpu.dot_dimension_numbers<[1], [0], [0], [1], [0, 0, 1, 1], [], []>} : vector<16x16xf32>, vector<16x32xf32>, vector<16x32xf32> -> vector<16x32xf32>
    %42 = arith.addf %40, %41 : vector<16x32xf32>
    %cst_29 = arith.constant dense<0.000000e+00> : vector<16x32xf32>
    %43 = tpu.matmul %38, %1, %cst_29 {dimension_numbers = #tpu.dot_dimension_numbers<[1], [0], [0], [1], [0, 0, 1, 1], [], []>} : vector<16x16xf32>, vector<16x32xf32>, vector<16x32xf32> -> vector<16x32xf32>
    %cst_30 = arith.constant dense<0.000000e+00> : vector<16x32xf32>
    %44 = tpu.matmul %39, %1, %cst_30 {dimension_numbers = #tpu.dot_dimension_numbers<[1], [0], [0], [1], [0, 0, 1, 1], [], []>} : vector<16x16xf32>, vector<16x32xf32>, vector<16x32xf32> -> vector<16x32xf32>
    %45 = arith.addf %43, %44 : vector<16x32xf32>
    %c0_31 = arith.constant 0 : index
    %46 = memref.load %arg5[%c0_31] : memref<64xf32, #tpu.memory_space<smem>>
    %47 = vector.broadcast %46 : f32 to vector<16x32xf32>
    %48 = arith.mulf %47, %9 : vector<16x32xf32>
    %c1_32 = arith.constant 1 : index
    %49 = memref.load %arg5[%c1_32] : memref<64xf32, #tpu.memory_space<smem>>
    %50 = vector.broadcast %49 : f32 to vector<16x32xf32>
    %51 = arith.mulf %50, %12 : vector<16x32xf32>
    %52 = arith.addf %48, %51 : vector<16x32xf32>
    %c16 = arith.constant 16 : index
    %53 = memref.load %arg5[%c16] : memref<64xf32, #tpu.memory_space<smem>>
    %54 = vector.broadcast %53 : f32 to vector<16x32xf32>
    %55 = arith.mulf %54, %20 : vector<16x32xf32>
    %c17 = arith.constant 17 : index
    %56 = memref.load %arg5[%c17] : memref<64xf32, #tpu.memory_space<smem>>
    %57 = vector.broadcast %56 : f32 to vector<16x32xf32>
    %58 = arith.mulf %57, %23 : vector<16x32xf32>
    %59 = arith.addf %55, %58 : vector<16x32xf32>
    %60 = arith.addf %52, %59 : vector<16x32xf32>
    %c32 = arith.constant 32 : index
    %61 = memref.load %arg5[%c32] : memref<64xf32, #tpu.memory_space<smem>>
    %62 = vector.broadcast %61 : f32 to vector<16x32xf32>
    %63 = arith.mulf %62, %31 : vector<16x32xf32>
    %c33 = arith.constant 33 : index
    %64 = memref.load %arg5[%c33] : memref<64xf32, #tpu.memory_space<smem>>
    %65 = vector.broadcast %64 : f32 to vector<16x32xf32>
    %66 = arith.mulf %65, %34 : vector<16x32xf32>
    %67 = arith.addf %63, %66 : vector<16x32xf32>
    %68 = arith.addf %60, %67 : vector<16x32xf32>
    %c48 = arith.constant 48 : index
    %69 = memref.load %arg5[%c48] : memref<64xf32, #tpu.memory_space<smem>>
    %70 = vector.broadcast %69 : f32 to vector<16x32xf32>
    %71 = arith.mulf %70, %42 : vector<16x32xf32>
    %c49 = arith.constant 49 : index
    %72 = memref.load %arg5[%c49] : memref<64xf32, #tpu.memory_space<smem>>
    %73 = vector.broadcast %72 : f32 to vector<16x32xf32>
    %74 = arith.mulf %73, %45 : vector<16x32xf32>
    %75 = arith.addf %71, %74 : vector<16x32xf32>
    %76 = arith.addf %68, %75 : vector<16x32xf32>
    %c0_33 = arith.constant 0 : index
    %77 = memref.load %arg6[%c0_33] : memref<4xf32, #tpu.memory_space<smem>>
    %78 = vector.broadcast %77 : f32 to vector<16x32xf32>
    %79 = arith.addf %76, %78 : vector<16x32xf32>
    %c2_34 = arith.constant 2 : index
    %80 = memref.load %arg5[%c2_34] : memref<64xf32, #tpu.memory_space<smem>>
    %81 = vector.broadcast %80 : f32 to vector<16x32xf32>
    %82 = arith.mulf %81, %9 : vector<16x32xf32>
    %c3_35 = arith.constant 3 : index
    %83 = memref.load %arg5[%c3_35] : memref<64xf32, #tpu.memory_space<smem>>
    %84 = vector.broadcast %83 : f32 to vector<16x32xf32>
    %85 = arith.mulf %84, %12 : vector<16x32xf32>
    %86 = arith.addf %82, %85 : vector<16x32xf32>
    %c18 = arith.constant 18 : index
    %87 = memref.load %arg5[%c18] : memref<64xf32, #tpu.memory_space<smem>>
    %88 = vector.broadcast %87 : f32 to vector<16x32xf32>
    %89 = arith.mulf %88, %20 : vector<16x32xf32>
    %c19 = arith.constant 19 : index
    %90 = memref.load %arg5[%c19] : memref<64xf32, #tpu.memory_space<smem>>
    %91 = vector.broadcast %90 : f32 to vector<16x32xf32>
    %92 = arith.mulf %91, %23 : vector<16x32xf32>
    %93 = arith.addf %89, %92 : vector<16x32xf32>
    %94 = arith.addf %86, %93 : vector<16x32xf32>
    %c34 = arith.constant 34 : index
    %95 = memref.load %arg5[%c34] : memref<64xf32, #tpu.memory_space<smem>>
    %96 = vector.broadcast %95 : f32 to vector<16x32xf32>
    %97 = arith.mulf %96, %31 : vector<16x32xf32>
    %c35 = arith.constant 35 : index
    %98 = memref.load %arg5[%c35] : memref<64xf32, #tpu.memory_space<smem>>
    %99 = vector.broadcast %98 : f32 to vector<16x32xf32>
    %100 = arith.mulf %99, %34 : vector<16x32xf32>
    %101 = arith.addf %97, %100 : vector<16x32xf32>
    %102 = arith.addf %94, %101 : vector<16x32xf32>
    %c50 = arith.constant 50 : index
    %103 = memref.load %arg5[%c50] : memref<64xf32, #tpu.memory_space<smem>>
    %104 = vector.broadcast %103 : f32 to vector<16x32xf32>
    %105 = arith.mulf %104, %42 : vector<16x32xf32>
    %c51 = arith.constant 51 : index
    %106 = memref.load %arg5[%c51] : memref<64xf32, #tpu.memory_space<smem>>
    %107 = vector.broadcast %106 : f32 to vector<16x32xf32>
    %108 = arith.mulf %107, %45 : vector<16x32xf32>
    %109 = arith.addf %105, %108 : vector<16x32xf32>
    %110 = arith.addf %102, %109 : vector<16x32xf32>
    %c0_36 = arith.constant 0 : index
    %111 = memref.load %arg6[%c0_36] : memref<4xf32, #tpu.memory_space<smem>>
    %112 = vector.broadcast %111 : f32 to vector<16x32xf32>
    %113 = arith.addf %110, %112 : vector<16x32xf32>
    %114 = tpu.concatenate %79, %113 in 1 : vector<16x32xf32>, vector<16x32xf32> -> vector<16x64xf32>
    %c0_37 = arith.constant 0 : index
    %c0_38 = arith.constant 0 : index
    %c0_39 = arith.constant 0 : index
    %c0_40 = arith.constant 0 : index
    %115 = vector.load %arg7[%c0_37, %c0_38, %c0_39, %c0_40] : memref<1x4x16x64xf32, #tpu.memory_space<vmem>>, vector<1x1x16x64xf32>
    %116 = vector.shape_cast %115 : vector<1x1x16x64xf32> to vector<16x64xf32>
    %117 = vector.shape_cast %114 : vector<16x64xf32> to vector<1x1x16x64xf32>
    tpu.vector_store %arg7[%c0_37, %c0_38, %c0_39, %c0_40], %117 {strides = array<i32>} : memref<1x4x16x64xf32, #tpu.memory_space<vmem>>, vector<1x1x16x64xf32>,
    %c4 = arith.constant 4 : index
    %118 = memref.load %arg5[%c4] : memref<64xf32, #tpu.memory_space<smem>>
    %119 = vector.broadcast %118 : f32 to vector<16x32xf32>
    %120 = arith.mulf %119, %9 : vector<16x32xf32>
    %c5 = arith.constant 5 : index
    %121 = memref.load %arg5[%c5] : memref<64xf32, #tpu.memory_space<smem>>
    %122 = vector.broadcast %121 : f32 to vector<16x32xf32>
    %123 = arith.mulf %122, %12 : vector<16x32xf32>
    %124 = arith.addf %120, %123 : vector<16x32xf32>
    %c20 = arith.constant 20 : index
    %125 = memref.load %arg5[%c20] : memref<64xf32, #tpu.memory_space<smem>>
    %126 = vector.broadcast %125 : f32 to vector<16x32xf32>
    %127 = arith.mulf %126, %20 : vector<16x32xf32>
    %c21 = arith.constant 21 : index
    %128 = memref.load %arg5[%c21] : memref<64xf32, #tpu.memory_space<smem>>
    %129 = vector.broadcast %128 : f32 to vector<16x32xf32>
    %130 = arith.mulf %129, %23 : vector<16x32xf32>
    %131 = arith.addf %127, %130 : vector<16x32xf32>
    %132 = arith.addf %124, %131 : vector<16x32xf32>
    %c36 = arith.constant 36 : index
    %133 = memref.load %arg5[%c36] : memref<64xf32, #tpu.memory_space<smem>>
    %134 = vector.broadcast %133 : f32 to vector<16x32xf32>
    %135 = arith.mulf %134, %31 : vector<16x32xf32>
    %c37 = arith.constant 37 : index
    %136 = memref.load %arg5[%c37] : memref<64xf32, #tpu.memory_space<smem>>
    %137 = vector.broadcast %136 : f32 to vector<16x32xf32>
    %138 = arith.mulf %137, %34 : vector<16x32xf32>
    %139 = arith.addf %135, %138 : vector<16x32xf32>
    %140 = arith.addf %132, %139 : vector<16x32xf32>
    %c52 = arith.constant 52 : index
    %141 = memref.load %arg5[%c52] : memref<64xf32, #tpu.memory_space<smem>>
    %142 = vector.broadcast %141 : f32 to vector<16x32xf32>
    %143 = arith.mulf %142, %42 : vector<16x32xf32>
    %c53 = arith.constant 53 : index
    %144 = memref.load %arg5[%c53] : memref<64xf32, #tpu.memory_space<smem>>
    %145 = vector.broadcast %144 : f32 to vector<16x32xf32>
    %146 = arith.mulf %145, %45 : vector<16x32xf32>
    %147 = arith.addf %143, %146 : vector<16x32xf32>
    %148 = arith.addf %140, %147 : vector<16x32xf32>
    %c1_41 = arith.constant 1 : index
    %149 = memref.load %arg6[%c1_41] : memref<4xf32, #tpu.memory_space<smem>>
    %150 = vector.broadcast %149 : f32 to vector<16x32xf32>
    %151 = arith.addf %148, %150 : vector<16x32xf32>
    %c6 = arith.constant 6 : index
    %152 = memref.load %arg5[%c6] : memref<64xf32, #tpu.memory_space<smem>>
    %153 = vector.broadcast %152 : f32 to vector<16x32xf32>
    %154 = arith.mulf %153, %9 : vector<16x32xf32>
    %c7 = arith.constant 7 : index
    %155 = memref.load %arg5[%c7] : memref<64xf32, #tpu.memory_space<smem>>
    %156 = vector.broadcast %155 : f32 to vector<16x32xf32>
    %157 = arith.mulf %156, %12 : vector<16x32xf32>
    %158 = arith.addf %154, %157 : vector<16x32xf32>
    %c22 = arith.constant 22 : index
    %159 = memref.load %arg5[%c22] : memref<64xf32, #tpu.memory_space<smem>>
    %160 = vector.broadcast %159 : f32 to vector<16x32xf32>
    %161 = arith.mulf %160, %20 : vector<16x32xf32>
    %c23 = arith.constant 23 : index
    %162 = memref.load %arg5[%c23] : memref<64xf32, #tpu.memory_space<smem>>
    %163 = vector.broadcast %162 : f32 to vector<16x32xf32>
    %164 = arith.mulf %163, %23 : vector<16x32xf32>
    %165 = arith.addf %161, %164 : vector<16x32xf32>
    %166 = arith.addf %158, %165 : vector<16x32xf32>
    %c38 = arith.constant 38 : index
    %167 = memref.load %arg5[%c38] : memref<64xf32, #tpu.memory_space<smem>>
    %168 = vector.broadcast %167 : f32 to vector<16x32xf32>
    %169 = arith.mulf %168, %31 : vector<16x32xf32>
    %c39 = arith.constant 39 : index
    %170 = memref.load %arg5[%c39] : memref<64xf32, #tpu.memory_space<smem>>
    %171 = vector.broadcast %170 : f32 to vector<16x32xf32>
    %172 = arith.mulf %171, %34 : vector<16x32xf32>
    %173 = arith.addf %169, %172 : vector<16x32xf32>
    %174 = arith.addf %166, %173 : vector<16x32xf32>
    %c54 = arith.constant 54 : index
    %175 = memref.load %arg5[%c54] : memref<64xf32, #tpu.memory_space<smem>>
    %176 = vector.broadcast %175 : f32 to vector<16x32xf32>
    %177 = arith.mulf %176, %42 : vector<16x32xf32>
    %c55 = arith.constant 55 : index
    %178 = memref.load %arg5[%c55] : memref<64xf32, #tpu.memory_space<smem>>
    %179 = vector.broadcast %178 : f32 to vector<16x32xf32>
    %180 = arith.mulf %179, %45 : vector<16x32xf32>
    %181 = arith.addf %177, %180 : vector<16x32xf32>
    %182 = arith.addf %174, %181 : vector<16x32xf32>
    %c1_42 = arith.constant 1 : index
    %183 = memref.load %arg6[%c1_42] : memref<4xf32, #tpu.memory_space<smem>>
    %184 = vector.broadcast %183 : f32 to vector<16x32xf32>
    %185 = arith.addf %182, %184 : vector<16x32xf32>
    %186 = tpu.concatenate %151, %185 in 1 : vector<16x32xf32>, vector<16x32xf32> -> vector<16x64xf32>
    %c0_43 = arith.constant 0 : index
    %c1_44 = arith.constant 1 : index
    %c0_45 = arith.constant 0 : index
    %c0_46 = arith.constant 0 : index
    %187 = vector.load %arg7[%c0_43, %c1_44, %c0_45, %c0_46] : memref<1x4x16x64xf32, #tpu.memory_space<vmem>>, vector<1x1x16x64xf32>
    %188 = vector.shape_cast %187 : vector<1x1x16x64xf32> to vector<16x64xf32>
    %189 = vector.shape_cast %186 : vector<16x64xf32> to vector<1x1x16x64xf32>
    tpu.vector_store %arg7[%c0_43, %c1_44, %c0_45, %c0_46], %189 {strides = array<i32>} : memref<1x4x16x64xf32, #tpu.memory_space<vmem>>, vector<1x1x16x64xf32>,
    %c8 = arith.constant 8 : index
    %190 = memref.load %arg5[%c8] : memref<64xf32, #tpu.memory_space<smem>>
    %191 = vector.broadcast %190 : f32 to vector<16x32xf32>
    %192 = arith.mulf %191, %9 : vector<16x32xf32>
    %c9 = arith.constant 9 : index
    %193 = memref.load %arg5[%c9] : memref<64xf32, #tpu.memory_space<smem>>
    %194 = vector.broadcast %193 : f32 to vector<16x32xf32>
    %195 = arith.mulf %194, %12 : vector<16x32xf32>
    %196 = arith.addf %192, %195 : vector<16x32xf32>
    %c24 = arith.constant 24 : index
    %197 = memref.load %arg5[%c24] : memref<64xf32, #tpu.memory_space<smem>>
    %198 = vector.broadcast %197 : f32 to vector<16x32xf32>
    %199 = arith.mulf %198, %20 : vector<16x32xf32>
    %c25 = arith.constant 25 : index
    %200 = memref.load %arg5[%c25] : memref<64xf32, #tpu.memory_space<smem>>
    %201 = vector.broadcast %200 : f32 to vector<16x32xf32>
    %202 = arith.mulf %201, %23 : vector<16x32xf32>
    %203 = arith.addf %199, %202 : vector<16x32xf32>
    %204 = arith.addf %196, %203 : vector<16x32xf32>
    %c40 = arith.constant 40 : index
    %205 = memref.load %arg5[%c40] : memref<64xf32, #tpu.memory_space<smem>>
    %206 = vector.broadcast %205 : f32 to vector<16x32xf32>
    %207 = arith.mulf %206, %31 : vector<16x32xf32>
    %c41 = arith.constant 41 : index
    %208 = memref.load %arg5[%c41] : memref<64xf32, #tpu.memory_space<smem>>
    %209 = vector.broadcast %208 : f32 to vector<16x32xf32>
    %210 = arith.mulf %209, %34 : vector<16x32xf32>
    %211 = arith.addf %207, %210 : vector<16x32xf32>
    %212 = arith.addf %204, %211 : vector<16x32xf32>
    %c56 = arith.constant 56 : index
    %213 = memref.load %arg5[%c56] : memref<64xf32, #tpu.memory_space<smem>>
    %214 = vector.broadcast %213 : f32 to vector<16x32xf32>
    %215 = arith.mulf %214, %42 : vector<16x32xf32>
    %c57 = arith.constant 57 : index
    %216 = memref.load %arg5[%c57] : memref<64xf32, #tpu.memory_space<smem>>
    %217 = vector.broadcast %216 : f32 to vector<16x32xf32>
    %218 = arith.mulf %217, %45 : vector<16x32xf32>
    %219 = arith.addf %215, %218 : vector<16x32xf32>
    %220 = arith.addf %212, %219 : vector<16x32xf32>
    %c2_47 = arith.constant 2 : index
    %221 = memref.load %arg6[%c2_47] : memref<4xf32, #tpu.memory_space<smem>>
    %222 = vector.broadcast %221 : f32 to vector<16x32xf32>
    %223 = arith.addf %220, %222 : vector<16x32xf32>
    %c10 = arith.constant 10 : index
    %224 = memref.load %arg5[%c10] : memref<64xf32, #tpu.memory_space<smem>>
    %225 = vector.broadcast %224 : f32 to vector<16x32xf32>
    %226 = arith.mulf %225, %9 : vector<16x32xf32>
    %c11 = arith.constant 11 : index
    %227 = memref.load %arg5[%c11] : memref<64xf32, #tpu.memory_space<smem>>
    %228 = vector.broadcast %227 : f32 to vector<16x32xf32>
    %229 = arith.mulf %228, %12 : vector<16x32xf32>
    %230 = arith.addf %226, %229 : vector<16x32xf32>
    %c26 = arith.constant 26 : index
    %231 = memref.load %arg5[%c26] : memref<64xf32, #tpu.memory_space<smem>>
    %232 = vector.broadcast %231 : f32 to vector<16x32xf32>
    %233 = arith.mulf %232, %20 : vector<16x32xf32>
    %c27 = arith.constant 27 : index
    %234 = memref.load %arg5[%c27] : memref<64xf32, #tpu.memory_space<smem>>
    %235 = vector.broadcast %234 : f32 to vector<16x32xf32>
    %236 = arith.mulf %235, %23 : vector<16x32xf32>
    %237 = arith.addf %233, %236 : vector<16x32xf32>
    %238 = arith.addf %230, %237 : vector<16x32xf32>
    %c42 = arith.constant 42 : index
    %239 = memref.load %arg5[%c42] : memref<64xf32, #tpu.memory_space<smem>>
    %240 = vector.broadcast %239 : f32 to vector<16x32xf32>
    %241 = arith.mulf %240, %31 : vector<16x32xf32>
    %c43 = arith.constant 43 : index
    %242 = memref.load %arg5[%c43] : memref<64xf32, #tpu.memory_space<smem>>
    %243 = vector.broadcast %242 : f32 to vector<16x32xf32>
    %244 = arith.mulf %243, %34 : vector<16x32xf32>
    %245 = arith.addf %241, %244 : vector<16x32xf32>
    %246 = arith.addf %238, %245 : vector<16x32xf32>
    %c58 = arith.constant 58 : index
    %247 = memref.load %arg5[%c58] : memref<64xf32, #tpu.memory_space<smem>>
    %248 = vector.broadcast %247 : f32 to vector<16x32xf32>
    %249 = arith.mulf %248, %42 : vector<16x32xf32>
    %c59 = arith.constant 59 : index
    %250 = memref.load %arg5[%c59] : memref<64xf32, #tpu.memory_space<smem>>
    %251 = vector.broadcast %250 : f32 to vector<16x32xf32>
    %252 = arith.mulf %251, %45 : vector<16x32xf32>
    %253 = arith.addf %249, %252 : vector<16x32xf32>
    %254 = arith.addf %246, %253 : vector<16x32xf32>
    %c2_48 = arith.constant 2 : index
    %255 = memref.load %arg6[%c2_48] : memref<4xf32, #tpu.memory_space<smem>>
    %256 = vector.broadcast %255 : f32 to vector<16x32xf32>
    %257 = arith.addf %254, %256 : vector<16x32xf32>
    %258 = tpu.concatenate %223, %257 in 1 : vector<16x32xf32>, vector<16x32xf32> -> vector<16x64xf32>
    %c0_49 = arith.constant 0 : index
    %c2_50 = arith.constant 2 : index
    %c0_51 = arith.constant 0 : index
    %c0_52 = arith.constant 0 : index
    %259 = vector.load %arg7[%c0_49, %c2_50, %c0_51, %c0_52] : memref<1x4x16x64xf32, #tpu.memory_space<vmem>>, vector<1x1x16x64xf32>
    %260 = vector.shape_cast %259 : vector<1x1x16x64xf32> to vector<16x64xf32>
    %261 = vector.shape_cast %258 : vector<16x64xf32> to vector<1x1x16x64xf32>
    tpu.vector_store %arg7[%c0_49, %c2_50, %c0_51, %c0_52], %261 {strides = array<i32>} : memref<1x4x16x64xf32, #tpu.memory_space<vmem>>, vector<1x1x16x64xf32>,
    %c12 = arith.constant 12 : index
    %262 = memref.load %arg5[%c12] : memref<64xf32, #tpu.memory_space<smem>>
    %263 = vector.broadcast %262 : f32 to vector<16x32xf32>
    %264 = arith.mulf %263, %9 : vector<16x32xf32>
    %c13 = arith.constant 13 : index
    %265 = memref.load %arg5[%c13] : memref<64xf32, #tpu.memory_space<smem>>
    %266 = vector.broadcast %265 : f32 to vector<16x32xf32>
    %267 = arith.mulf %266, %12 : vector<16x32xf32>
    %268 = arith.addf %264, %267 : vector<16x32xf32>
    %c28 = arith.constant 28 : index
    %269 = memref.load %arg5[%c28] : memref<64xf32, #tpu.memory_space<smem>>
    %270 = vector.broadcast %269 : f32 to vector<16x32xf32>
    %271 = arith.mulf %270, %20 : vector<16x32xf32>
    %c29 = arith.constant 29 : index
    %272 = memref.load %arg5[%c29] : memref<64xf32, #tpu.memory_space<smem>>
    %273 = vector.broadcast %272 : f32 to vector<16x32xf32>
    %274 = arith.mulf %273, %23 : vector<16x32xf32>
    %275 = arith.addf %271, %274 : vector<16x32xf32>
    %276 = arith.addf %268, %275 : vector<16x32xf32>
    %c44 = arith.constant 44 : index
    %277 = memref.load %arg5[%c44] : memref<64xf32, #tpu.memory_space<smem>>
    %278 = vector.broadcast %277 : f32 to vector<16x32xf32>
    %279 = arith.mulf %278, %31 : vector<16x32xf32>
    %c45 = arith.constant 45 : index
    %280 = memref.load %arg5[%c45] : memref<64xf32, #tpu.memory_space<smem>>
    %281 = vector.broadcast %280 : f32 to vector<16x32xf32>
    %282 = arith.mulf %281, %34 : vector<16x32xf32>
    %283 = arith.addf %279, %282 : vector<16x32xf32>
    %284 = arith.addf %276, %283 : vector<16x32xf32>
    %c60 = arith.constant 60 : index
    %285 = memref.load %arg5[%c60] : memref<64xf32, #tpu.memory_space<smem>>
    %286 = vector.broadcast %285 : f32 to vector<16x32xf32>
    %287 = arith.mulf %286, %42 : vector<16x32xf32>
    %c61 = arith.constant 61 : index
    %288 = memref.load %arg5[%c61] : memref<64xf32, #tpu.memory_space<smem>>
    %289 = vector.broadcast %288 : f32 to vector<16x32xf32>
    %290 = arith.mulf %289, %45 : vector<16x32xf32>
    %291 = arith.addf %287, %290 : vector<16x32xf32>
    %292 = arith.addf %284, %291 : vector<16x32xf32>
    %c3_53 = arith.constant 3 : index
    %293 = memref.load %arg6[%c3_53] : memref<4xf32, #tpu.memory_space<smem>>
    %294 = vector.broadcast %293 : f32 to vector<16x32xf32>
    %295 = arith.addf %292, %294 : vector<16x32xf32>
    %c14 = arith.constant 14 : index
    %296 = memref.load %arg5[%c14] : memref<64xf32, #tpu.memory_space<smem>>
    %297 = vector.broadcast %296 : f32 to vector<16x32xf32>
    %298 = arith.mulf %297, %9 : vector<16x32xf32>
    %c15 = arith.constant 15 : index
    %299 = memref.load %arg5[%c15] : memref<64xf32, #tpu.memory_space<smem>>
    %300 = vector.broadcast %299 : f32 to vector<16x32xf32>
    %301 = arith.mulf %300, %12 : vector<16x32xf32>
    %302 = arith.addf %298, %301 : vector<16x32xf32>
    %c30 = arith.constant 30 : index
    %303 = memref.load %arg5[%c30] : memref<64xf32, #tpu.memory_space<smem>>
    %304 = vector.broadcast %303 : f32 to vector<16x32xf32>
    %305 = arith.mulf %304, %20 : vector<16x32xf32>
    %c31 = arith.constant 31 : index
    %306 = memref.load %arg5[%c31] : memref<64xf32, #tpu.memory_space<smem>>
    %307 = vector.broadcast %306 : f32 to vector<16x32xf32>
    %308 = arith.mulf %307, %23 : vector<16x32xf32>
    %309 = arith.addf %305, %308 : vector<16x32xf32>
    %310 = arith.addf %302, %309 : vector<16x32xf32>
    %c46 = arith.constant 46 : index
    %311 = memref.load %arg5[%c46] : memref<64xf32, #tpu.memory_space<smem>>
    %312 = vector.broadcast %311 : f32 to vector<16x32xf32>
    %313 = arith.mulf %312, %31 : vector<16x32xf32>
    %c47 = arith.constant 47 : index
    %314 = memref.load %arg5[%c47] : memref<64xf32, #tpu.memory_space<smem>>
    %315 = vector.broadcast %314 : f32 to vector<16x32xf32>
    %316 = arith.mulf %315, %34 : vector<16x32xf32>
    %317 = arith.addf %313, %316 : vector<16x32xf32>
    %318 = arith.addf %310, %317 : vector<16x32xf32>
    %c62 = arith.constant 62 : index
    %319 = memref.load %arg5[%c62] : memref<64xf32, #tpu.memory_space<smem>>
    %320 = vector.broadcast %319 : f32 to vector<16x32xf32>
    %321 = arith.mulf %320, %42 : vector<16x32xf32>
    %c63 = arith.constant 63 : index
    %322 = memref.load %arg5[%c63] : memref<64xf32, #tpu.memory_space<smem>>
    %323 = vector.broadcast %322 : f32 to vector<16x32xf32>
    %324 = arith.mulf %323, %45 : vector<16x32xf32>
    %325 = arith.addf %321, %324 : vector<16x32xf32>
    %326 = arith.addf %318, %325 : vector<16x32xf32>
    %c3_54 = arith.constant 3 : index
    %327 = memref.load %arg6[%c3_54] : memref<4xf32, #tpu.memory_space<smem>>
    %328 = vector.broadcast %327 : f32 to vector<16x32xf32>
    %329 = arith.addf %326, %328 : vector<16x32xf32>
    %330 = tpu.concatenate %295, %329 in 1 : vector<16x32xf32>, vector<16x32xf32> -> vector<16x64xf32>
    %c0_55 = arith.constant 0 : index
    %c3_56 = arith.constant 3 : index
    %c0_57 = arith.constant 0 : index
    %c0_58 = arith.constant 0 : index
    %331 = vector.load %arg7[%c0_55, %c3_56, %c0_57, %c0_58] : memref<1x4x16x64xf32, #tpu.memory_space<vmem>>, vector<1x1x16x64xf32>
    %332 = vector.shape_cast %331 : vector<1x1x16x64xf32> to vector<16x64xf32>
    %333 = vector.shape_cast %330 : vector<16x64xf32> to vector<1x1x16x64xf32>
    tpu.vector_store %arg7[%c0_55, %c3_56, %c0_57, %c0_58], %333 {strides = array<i32>} : memref<1x4x16x64xf32, #tpu.memory_space<vmem>>, vector<1x1x16x64xf32>,
    return
  }
  func.func @transform_0(%arg0: i32, %arg1: i32) -> (i32, i32, i32, i32) {
    %c0_i32 = arith.constant 0 : i32
    %c0_i32_0 = arith.constant 0 : i32
    %c0_i32_1 = arith.constant 0 : i32
    return %arg0, %c0_i32, %arg1, %c0_i32_0 : i32, i32, i32, i32
  }
  func.func @transform_1(%arg0: i32, %arg1: i32) -> (i32, i32) {
    %c0_i32 = arith.constant 0 : i32
    %c0_i32_0 = arith.constant 0 : i32
    %c0_i32_1 = arith.constant 0 : i32
    return %c0_i32, %c0_i32_0 : i32, i32
  }
  func.func @transform_2(%arg0: i32, %arg1: i32) -> (i32, i32) {
    %c0_i32 = arith.constant 0 : i32
    %c0_i32_0 = arith.constant 0 : i32
    %c0_i32_1 = arith.constant 0 : i32
    return %c0_i32, %c0_i32_0 : i32, i32
  }
  func.func @transform_3(%arg0: i32, %arg1: i32) -> i32 {
    %c0_i32 = arith.constant 0 : i32
    %c0_i32_0 = arith.constant 0 : i32
    return %c0_i32 : i32
  }
  func.func @transform_4(%arg0: i32, %arg1: i32) -> i32 {
    %c0_i32 = arith.constant 0 : i32
    %c0_i32_0 = arith.constant 0 : i32
    return %c0_i32 : i32
  }
  func.func @transform_5(%arg0: i32, %arg1: i32) -> (i32, i32, i32, i32) {
    %c0_i32 = arith.constant 0 : i32
    %c0_i32_0 = arith.constant 0 : i32
    %c0_i32_1 = arith.constant 0 : i32
    return %arg0, %c0_i32, %arg1, %c0_i32_0 : i32, i32, i32, i32
  }
}

</mosaic_0001>

<bundles_post_ra>
// kernel: transition_up.1
= control target key start
LH: loop header
LB: loop body
LE: loop exit
PB: predicated region body
PF: predicated region fallthrough
CT: control target
= control target key end

     0   :  { %s2619_s0 = inlined_call_operand.hbm [shape: f32[2,4,16,16], index: 0, kind: input, shape index: {}]   ;;  %s2620_s1 = inlined_call_operand.vmem [shape: f32[16,32], index: 1, kind: input, shape index: {}]   ;;  %s2621_s2 = inlined_call_operand.vmem [shape: f32[16,32], index: 2, kind: input, shape index: {}]   ;;  %s2622_s3 = inlined_call_operand.vmem [shape: f32[64], index: 3, kind: input, shape index: {}]   ;;  %s2623_s4 = inlined_call_operand.vmem [shape: f32[4], index: 4, kind: input, shape index: {}]   ;;  %s2624_s5 = inlined_call_operand.vmem [shape: f32[2,4,16,64], index: 5, kind: output, shape index: {}]  }
   0x1   :  { %2672 = sst [smem:[#allocation35_spill]] %s2619_s0 }
   0x2   :  { %2673 = sst [smem:[#allocation36_spill]] %s2620_s1 }
   0x3   :  { %2674 = sst [smem:[#allocation37_spill]] %s2621_s2 }
   0x4   :  { %2675 = sst [smem:[#allocation38_spill]] %s2622_s3 }
   0x5   :  { %2676 = sst [smem:[#allocation39_spill]] %s2623_s4 }
   0x6   :  { %2677 = sst [smem:[#allocation40_spill]] %s2624_s5 }
   0x7   :  { %10 = vsyncpa [#allocation3], 0 }
   0x8   :  { %12 = vsyncpa [#allocation3 + $0x1], 0 }
   0x9   :  { %13 = vsyncpa [#allocation4], 0 }
   0xa   :  { %14 = vsyncpa [#allocation7], 0  ;;  %s1683_s18 = smov 0   ;;  %s1685_s19 = smov 0  }
   0xb   :  { %s1687_s20 = smov 0   ;;  %s1689_s21 = smov 0  }
   0xc   :  { %s1691_s22 = smov 0   ;;  %s1693_s23 = smov 0  }
   0xd LB: > { %2678 = sst [smem:[#allocation11_spill]] %s1630_s19  ;;  %s1320_s24 = sadd.s32 4294967295, %s1646_s23   ;;  %s1646_s23 = sphi %s1693_s23, %s20_s23   ;;  %s1642_s22 = sphi %s1691_s22, %s2781_s22   ;;  %s1638_s21 = sphi %s1689_s21, %s2780_s21   ;;  %s1634_s20 = sphi %s1687_s20, %s2779_s20   ;;  %s1630_s19 = sphi %s1685_s19, %s2778_s19   ;;  %s1626_s18 = sphi %s1683_s18, %s2777_s18  }
   0xe   : > { %2679 = sst [smem:[#allocation12_spill]] %s1634_s20  ;;  %s41_s25 = sadd.s32 1, %s1634_s20 }
   0xf   : > { %2680 = sst [smem:[#allocation13_spill]] %s1638_s21  ;;  %p48_p0 = scmp.ne.s32.totalorder %s1634_s20, %s1630_s19 }
  0x10   : > { %2681 = sst [smem:[#allocation14_spill]] %s1642_s22  ;;  %p49_p1 = scmp.eq.s32.totalorder %s1646_s23, 0 }
  0x11   : > { %2682 = sst [smem:[#allocation15_spill]] %s1646_s23  ;;  %p54_p2 = scmp.ne.s32.totalorder %s1630_s19, %s1626_s18 }
  0x12   : > { %p1717_p3 = scmp.eq.s32.totalorder %s1320_s24, 0  ;;  %p50_p4 = por %p49_p1, %p48_p0 }
  0x13   : > { %p1322_p5 = scmp.ge.s32.totalorder %s1646_s23, 1  ;;  %p177_p7 = scmp.lt.s32.totalorder %s1646_s23, 3 }
  0x14   : > { %p1724_p6 = por %p1717_p3, %p54_p2  ;;  %s2685_s3 = sld [smem:[#allocation38_spill]] }
  0x15   : > { %p1732_p8 = pnand %p1322_p5, %p177_p7  ;;  %p1472_p10 = scmp.lt.s32.totalorder %s1646_s23, 2 }
  0x16   : > { %s2687_s4 = sld [smem:[#allocation39_spill]]  ;;  %s1648_s11 = smov [#allocation5]  }
  0x17   : > { %p1459_p9 = pneg %p1732_p8  ;;  %p1744_p12 = pnand %p1472_p10, %p50_p4 }
  0x18   : > { %s1649_s12 = smov [#allocation6]   ;;  %s216_s13 = sand.u32 1, %s1634_s20  }
  0x19   : > { %p1460_p11 = pnand %p1459_p9, %p1717_p3  ;;  %s32_s14 = sadd.s32 1, %s1642_s22 }
  0x1a   : > { %s195_s30 = sshll.u32 %s2685_s3, 4  ;;  %p34_p13 = scmp.ge.s32.totalorder %s32_s14, 2  ;;  %s196_s30 = int_to_ptr.vmem [resolvable:$true] %s195_s30 }
  0x1b   : > { %1462 = dma.vmem_to_smem (!%p1460_p11), %s196_s30, 16, %s1648_s11, [#allocation4]  }
  0x1c   : > { %s205_s9 = sshll.u32 %s2687_s4, 4  ;;  %s1326_s15 = sshll.u32 %s216_s13, 6  ;;  %s206_s9 = int_to_ptr.vmem [resolvable:$true] %s205_s9 }
  0x1d   : > { %1465 = dma.vmem_to_smem (!%p1460_p11), %s206_s9, 16, %s1649_s12, [#allocation7]  }
  0x1e   : > { %s1447_s16 = sshll.u32 %s1642_s22, 6  ;;  %s2783_s14 = smov (%p34_p13, %s32_s14), 0 }
  0x1f   : > { %2689 = sst [smem:[#allocation16_spill]] %s2783_s14  ;;  %s220_s28 = scalar_lea.vmem [#allocation2], %s1326_s15 }
  0x20   : > { %s2690_s0 = sld [smem:[#allocation35_spill]]  ;;  %s230_s29 = sshll.u32 %s220_s28, 4  ;;  %s231_s29 = int_to_ptr.vmem [resolvable:$true] %s230_s29 }
  0x21   : > { %s36_s30 = ssub.s32 %s1642_s22, %s2783_s14  ;;  %s217_s9 = scalar_lea.sflag [#allocation3], %s216_s13 }
  0x22   : > { %p39_p0 = scmp.eq.s32.totalorder %s36_s30, 0  ;;  %s1650_s11 = smov 128  }
  0x23   : > { %s1651_s12 = smov 8  }
  0x24   : > { %s1761_s8 = scalar_select %p39_p0, %s1634_s20, %s41_s25  }
  0x25   : > { %242 = sbr.rel (%p1732_p8) target bundleno = 397 (0x18d), region = 40 }
  0x26   : > { %s227_s24 = scalar_lea.hbm %s2690_s0, %s1447_s16  ;;  %2691 = sst [smem:[#allocation17_spill]] %s1761_s8 }
  0x27   : > { %s228_s7 = sshll.u32 %s227_s24, 4  ;;  %s229_s7 = int_to_ptr.hbm [resolvable:$true] %s228_s7 }
  0x28   : > { %1469 = dma.hbm_to_vmem [thread:$0]  (!%p1744_p12), %s229_s7, 1024, %s231_s29, %s217_s9, %s1650_s11, %s1650_s11, %s1651_s12  }
  0x2a   : > { %s244_s15 = sand.u32 1, %s1630_s19  }
  0x2b   : > { %s1330_s16 = sshll.u32 %s244_s15, 6  ;;  %s245_s17 = scalar_lea.sflag [#allocation3], %s244_s15 }
  0x2c   : > { %s1768_s18 = scalar_lea.vmem [#allocation2], %s1330_s16 }
  0x2d   : > { %1613 = dma.done.wait (%p1724_p6), %s245_s17, 1024  }
  0x2e   : > { %1615 = vsyncadd (%p1724_p6), %s245_s17, 4294966272 }
  0x2f   : > { %1617 = dma.done.wait (%p1717_p3), [#allocation4], 16  }
  0x30   : > { %1619 = vsyncadd (%p1717_p3), [#allocation4], 4294967280 }
  0x31   : > { %1621 = dma.done.wait (%p1717_p3), [#allocation7], 16  }
  0x32   : > { %1623 = vsyncadd (%p1717_p3), [#allocation7], 4294967280 }
  0x33   : > { %264 = sfence }
  0x34   : > { %s2692_s2 = sld [smem:[#allocation37_spill]]  ;;  %v306_v2 = vld [vmem:[%s1768_s18] sm:$0xff]  ;;  %v307_v5 = vld [vmem:[%s1768_s18 + $0x8] sm:$0xff]  ;;  %vm314_vm0 = vcmask 130048   ;;  %v1343_v11 = vld [vmem:[%s1768_s18 + $0x10] sm:$0xff]  ;;  %vm864_vm1 = vcmask 261120  }
  0x35   : > { %v308_v3 = vpack.c.bf16 %v306_v2, %v306_v2  ;;  %s2693_s1 = sld [smem:[#allocation36_spill]]  ;;  %v309_v8 = vpack.c.bf16 %v307_v5, %v307_v5  ;;  %v422_v13 = vpack.c.bf16 %v1343_v11, %v1343_v11  ;;  %v1344_v15 = vld [vmem:[%s1768_s18 + $0x18] sm:$0xff]  ;;  %v1353_v19 = vld [vmem:[%s1768_s18 + $0x20] sm:$0xff]  ;;  %v1354_v23 = vld [vmem:[%s1768_s18 + $0x28] sm:$0xff]  ;;  %vm867_vm2 = vcmask 523264  }
  0x36   : > { %v423_v17 = vpack.c.bf16 %v1344_v15, %v1344_v15  ;;  %v535_v21 = vpack.c.bf16 %v1353_v19, %v1353_v19  ;;  %v536_v25 = vpack.c.bf16 %v1354_v23, %v1354_v23  ;;  %v1363_v27 = vld [vmem:[%s1768_s18 + $0x30] sm:$0xff]  ;;  %v1364_v31 = vld [vmem:[%s1768_s18 + $0x38] sm:$0xff]  ;;  %s1834_s29 = sld [smem:[#allocation5 + $0xa]] }
  0x37   : > { %v310_v7 = vunpack.c.l.bf16 %v308_v3  ;;  %v311_v10 = vunpack.c.l.bf16 %v309_v8  ;;  %v424_v14 = vunpack.c.l.bf16 %v422_v13  ;;  %v648_v29 = vpack.c.bf16 %v1363_v27, %v1363_v27  ;;  %s1836_s30 = sld [smem:[#allocation5 + $0xb]] }
  0x38   : > { %v425_v18 = vunpack.c.l.bf16 %v423_v17  ;;  %v537_v22 = vunpack.c.l.bf16 %v535_v21  ;;  %v538_v26 = vunpack.c.l.bf16 %v536_v25  ;;  %v649_v33 = vpack.c.bf16 %v1364_v31, %v1364_v31  ;;  %s1838_s7 = sld [smem:[#allocation5 + $0x6]] }
  0x39   : > { %v312_v9 = vsub.f32 %v306_v2, %v310_v7  ;;  %v313_v12 = vsub.f32 %v307_v5, %v311_v10  ;;  %v426_v16 = vsub.f32 %v1343_v11, %v424_v14  ;;  %v650_v30 = vunpack.c.l.bf16 %v648_v29  ;;  %s1840_s9 = sld [smem:[#allocation5 + $0x7]] }
  0x3a   : > { %v305_v0 = vld [vmem:[%s2692_s2 + $0x8] sm:$0xff]  ;;  %v304_v1 = vld [vmem:[%s2692_s2] sm:$0xff]  ;;  %v427_v20 = vsub.f32 %v1344_v15, %v425_v18  ;;  %v539_v24 = vsub.f32 %v1353_v19, %v537_v22  ;;  %v540_v28 = vsub.f32 %v1354_v23, %v538_v26  ;;  %v651_v34 = vunpack.c.l.bf16 %v649_v33  ;;  %s1842_s11 = sld [smem:[#allocation5 + $0x2]] }
  0x3b   : > { %387 = vmatpush.msra.mxu2 %v305_v0  ;;  %410 = vmatpush.msra.mxu3 %v305_v0  ;;  %v303_v4 = vld [vmem:[%s2693_s1 + $0x8] sm:$0xff]  ;;  %v302_v6 = vld [vmem:[%s2693_s1] sm:$0xff]  ;;  %v652_v32 = vsub.f32 %v1363_v27, %v650_v30  ;;  %s1844_s12 = sld [smem:[#allocation5 + $0x3]] }
  0x3c   : > { %335 = vmatpush.msra.mxu0 %v303_v4  ;;  %364 = vmatpush.msra.mxu1 %v303_v4  ;;  %v653_v35 = vsub.f32 %v1364_v31, %v651_v34  ;;  %s1846_s15 = sld [smem:[#allocation5 + $0xe]]  ;;  %v1032_v38 = vstv %s1834_s29 }
  0x3d   : > { %388 = vmatpush.msra.mxu2 %v304_v1  ;;  %411 = vmatpush.msra.mxu3 %v304_v1  ;;  %s1848_s16 = sld [smem:[#allocation5 + $0xf]]  ;;  %v1036_v39 = vstv %s1836_s30 }
  0x3e   : > { %1341 = vmatmul.msk.f32.vlgmr.msra.gmra.mxu3 %vm314_vm0, %v310_v7  ;;  %336 = vmatpush.msra.mxu0 %v302_v6  ;;  %s1850_s17 = sld [smem:[#allocation5 + $0x8]]  ;;  %v921_v40 = vstv %s1838_s7 }
  0x3f   : > { %500 = vmatpush.msrb.mxu2 %v305_v0  ;;  %523 = vmatpush.msrb.mxu3 %v305_v0  ;;  %s1852_s18 = sld [smem:[#allocation5 + $0x9]]  ;;  %v925_v41 = vstv %s1840_s9 }
  0x40   : > { %365 = vmatpush.msra.mxu1 %v302_v6  ;;  %448 = vmatpush.msrb.mxu0 %v303_v4  ;;  %s1854_s25 = sld [smem:[#allocation5 + $0x4]]  ;;  %v809_v42 = vstv %s1842_s11 }
  0x41   : > { %1339 = vmatmul.msk.f32.vlgmr.msra.gmra.mxu2 %vm314_vm0, %v312_v9  ;;  %1335 = vmatmul.msk.f32.vlgmr.msra.gmra.mxu0 %vm314_vm0, %v312_v9  ;;  %s1856_s6 = sld [smem:[#allocation5 + $0x5]]  ;;  %v813_v43 = vstv %s1844_s12 }
  0x42   : > { %1337 = vmatmul.msk.f32.vlgmr.msra.gmra.mxu1 %vm314_vm0, %v310_v7  ;;  %501 = vmatpush.msrb.mxu2 %v304_v1  ;;  %s1858_s27 = sld [smem:[#allocation5]]  ;;  %v1143_v44 = vstv %s1846_s15 }
  0x43   : > { %477 = vmatpush.msrb.mxu1 %v303_v4  ;;  %524 = vmatpush.msrb.mxu3 %v304_v1  ;;  %2694 = sst [smem:[#allocation18_spill]] %s1848_s16  ;;  %v1147_v45 = vstv %s1848_s16 }
  0x44   : > { %449 = vmatpush.msrb.mxu0 %v302_v6  ;;  %613 = vmatpush.msra.mxu2 %v305_v0  ;;  %s1860_s10 = sld [smem:[#allocation5 + $0x1]]  ;;  %v982_v46 = vstv %s1850_s17 }
  0x45   : > { %478 = vmatpush.msrb.mxu1 %v302_v6  ;;  %636 = vmatpush.msra.mxu3 %v305_v0  ;;  %s1862_s13 = sld [smem:[#allocation5 + $0x1a]]  ;;  %v986_v48 = vstv %s1852_s18 }
  0x46   : > { %561 = vmatpush.msra.mxu0 %v303_v4  ;;  %1342 = vmatmul.msk.f32.gmra.mxu3 %vm314_vm0, %v311_v10  ;;  %s1864_s24 = sld [smem:[#allocation5 + $0x1b]]  ;;  %v871_v49 = vstv %s1854_s25 }
  0x47   : > { %590 = vmatpush.msra.mxu1 %v303_v4  ;;  %614 = vmatpush.msra.mxu2 %v304_v1  ;;  %s1866_s26 = sld [smem:[#allocation5 + $0x16]]  ;;  %v875_v50 = vstv %s1856_s6 }
  0x48   : > { %637 = vmatpush.msra.mxu3 %v304_v1  ;;  %562 = vmatpush.msra.mxu0 %v302_v6  ;;  %2695 = sst [smem:[#allocation19_spill]] %s1858_s27  ;;  %v2663_v51 = vstv %s1858_s27 }
  0x49   : > { %1340 = vmatmul.msk.f32.gmra.mxu2 %vm314_vm0, %v313_v12  ;;  %1336 = vmatmul.msk.f32.gmra.mxu0 %vm314_vm0, %v313_v12  ;;  %s1868_s28 = sld [smem:[#allocation5 + $0x17]] }
  0x4a   : > { %1338 = vmatmul.msk.f32.gmra.mxu1 %vm314_vm0, %v311_v10  ;;  %s1870_s0 = sld [smem:[#allocation5 + $0x12]]  ;;  %v763_v55 = vstv %s1860_s10 }
  0x4b   : > { %591 = vmatpush.msra.mxu1 %v302_v6  ;;  %s1872_s1 = sld [smem:[#allocation5 + $0x13]]  ;;  %v1042_v53 = vstv %s1862_s13 }
  0x4c   : > { %2696 = sst [smem:[#allocation20_spill]] %s1864_s24  ;;  %v1046_v54 = vstv %s1864_s24 }
  0x4d   : > { %s1874_s2 = sld [smem:[#allocation5 + $0x1e]]  ;;  %v931_v57 = vstv %s1866_s26 }
  0x4e   : > { %1351 = vmatmul.msk.f32.vlgmr.msrb.gmra.mxu3 %vm314_vm0, %v424_v14  ;;  %s1876_s3 = sld [smem:[#allocation5 + $0x1f]] }
  0x4f   : > { %749 = vmatpush.msrb.mxu3 %v305_v0  ;;  %2697 = sst [smem:[#allocation21_spill]] %s1868_s28  ;;  %v935_v58 = vstv %s1868_s28 }
  0x50   : > { %s1878_s4 = sld [smem:[#allocation5 + $0x18]]  ;;  %v819_v59 = vstv %s1870_s0 }
  0x51   : > { %1349 = vmatmul.msk.f32.vlgmr.msrb.gmra.mxu2 %vm314_vm0, %v426_v16  ;;  %1345 = vmatmul.msk.f32.vlgmr.msrb.gmra.mxu0 %vm314_vm0, %v426_v16  ;;  %2698 = sst [smem:[#allocation22_spill]] %s1872_s1  ;;  %v823_v60 = vstv %s1872_s1 }
  0x52   : > { %1347 = vmatmul.msk.f32.vlgmr.msrb.gmra.mxu1 %vm314_vm0, %v424_v14  ;;  %726 = vmatpush.msrb.mxu2 %v305_v0  ;;  %s1880_s14 = sld [smem:[#allocation5 + $0x19]] }
  0x53   : > { %674 = vmatpush.msrb.mxu0 %v303_v4  ;;  %703 = vmatpush.msrb.mxu1 %v303_v4  ;;  %s1882_s22 = sld [smem:[#allocation5 + $0x14]]  ;;  %v1153_v62 = vstv %s1874_s2 }
  0x54   : > { %727 = vmatpush.msrb.mxu2 %v304_v1  ;;  %750 = vmatpush.msrb.mxu3 %v304_v1  ;;  %2699 = sst [smem:[#allocation23_spill]] %s1876_s3  ;;  %v1157_v63 = vstv %s1876_s3 }
  0x55   : > { %675 = vmatpush.msrb.mxu0 %v302_v6  ;;  %704 = vmatpush.msrb.mxu1 %v302_v6  ;;  %s1884_s8 = sld [smem:[#allocation5 + $0x15]] }
  0x56   : > { %1352 = vmatmul.msk.f32.gmra.mxu3 %vm314_vm0, %v425_v18  ;;  %2700 = sst [smem:[#allocation24_spill]] %s1878_s4  ;;  %v992_v0 = vstv %s1878_s4 }
  0x57   : > { %s1886_s20 = sld [smem:[#allocation5 + $0x10]] }
  0x58   : > { %2701 = sst [smem:[#allocation25_spill]] %s1880_s14  ;;  %v996_v2 = vstv %s1880_s14 }
  0x59   : > { %1350 = vmatmul.msk.f32.gmra.mxu2 %vm314_vm0, %v427_v20  ;;  %1346 = vmatmul.msk.f32.gmra.mxu0 %vm314_vm0, %v427_v20  ;;  %2702 = sst [smem:[#allocation26_spill]] %s1882_s22  ;;  %v2665_v3 = vstv %s1882_s22 }
  0x5a   : > { %1348 = vmatmul.msk.f32.gmra.mxu1 %vm314_vm0, %v425_v18  ;;  %s1888_s19 = sld [smem:[#allocation5 + $0x11]] }
  0x5b   : > { %2703 = sst [smem:[#allocation27_spill]] %s1884_s8 }
  0x5c   : > { %s1890_s23 = sld [smem:[#allocation5 + $0x2a]] }
  0x5d   : > { %2704 = sst [smem:[#allocation28_spill]] %s1886_s20  ;;  %v2664_v5 = vstv %s1886_s20 }
  0x5e   : > { %1361 = vmatmul.msk.f32.vlgmr.msra.gmra.mxu3 %vm314_vm0, %v537_v22  ;;  %s1892_s5 = sld [smem:[#allocation5 + $0x2b]] }
  0x5f   : > { %s1894_s21 = sld [smem:[#allocation5 + $0x26]] }
  0x60   : > { %2705 = sst [smem:[#allocation29_spill]] %s1888_s19  ;;  %v2667_v10 = vstv %s1888_s19 }
  0x61   : > { %1359 = vmatmul.msk.f32.vlgmr.msra.gmra.mxu2 %vm314_vm0, %v539_v24  ;;  %1355 = vmatmul.msk.f32.vlgmr.msra.gmra.mxu0 %vm314_vm0, %v539_v24  ;;  %s1897_s8 = sld [smem:[#allocation5 + $0x27]] }
  0x62   : > { %1357 = vmatmul.msk.f32.vlgmr.msra.gmra.mxu1 %vm314_vm0, %v537_v22  ;;  %2706 = sst [smem:[#allocation30_spill]] %s1890_s23 }
  0x63   : > { %s1903_s23 = sld [smem:[#allocation5 + $0x22]] }
  0x64   : > { %2707 = sst [smem:[#allocation31_spill]] %s1892_s5 }
  0x65   : > { %s1906_s5 = sld [smem:[#allocation5 + $0x23]]  ;;  %v943_v22 = vstv %s1894_s21 }
  0x66   : > { %1362 = vmatmul.msk.f32.gmra.mxu3 %vm314_vm0, %v538_v26  ;;  %s1921_s16 = sld [smem:[#allocation5 + $0x2f]] }
  0x67   : > { %2708 = sst [smem:[#allocation32_spill]] %s1897_s8 }
  0x68   : > { %s1911_s8 = sld [smem:[#allocation5 + $0x2e]] }
  0x69   : > { %1360 = vmatmul.msk.f32.gmra.mxu2 %vm314_vm0, %v540_v28  ;;  %1356 = vmatmul.msk.f32.gmra.mxu0 %vm314_vm0, %v540_v28  ;;  %s2712_s1 = sld [smem:[#allocation30_spill]]  ;;  %v831_v24 = vstv %s1903_s23 }
  0x6a   : > { %1358 = vmatmul.msk.f32.gmra.mxu1 %vm314_vm0, %v538_v26  ;;  %s2713_s3 = sld [smem:[#allocation31_spill]] }
  0x6b   : > { %2709 = sst [smem:[#allocation33_spill]] %s1906_s5 }
  0x6c   : > { %s2710_s5 = sld [smem:[#allocation27_spill]]  ;;  %v1169_v27 = vstv %s1921_s16 }
  0x6d   : > { %2711 = sst [smem:[#allocation34_spill]] %s1921_s16 }
  0x6e   : > { %1371 = vmatmul.msk.f32.vlgmr.msrb.gmra.mxu3 %vm314_vm0, %v650_v30  ;;  %s1946_s14 = sld [smem:[#allocation5 + $0x28]]  ;;  %v1165_v26 = vstv %s1911_s8 }
  0x6f   : > { %s2714_s28 = sld [smem:[#allocation32_spill]]  ;;  %v1054_v20 = vstv %s2712_s1 }
  0x70   : > { %s1961_s24 = sld [smem:[#allocation5 + $0x29]]  ;;  %v1058_v21 = vstv %s2713_s3 }
  0x71   : > { %1369 = vmatmul.msk.f32.vlgmr.msrb.gmra.mxu2 %vm314_vm0, %v652_v32  ;;  %1365 = vmatmul.msk.f32.vlgmr.msrb.gmra.mxu0 %vm314_vm0, %v652_v32  ;;  %s1971_s19 = sld [smem:[#allocation5 + $0x24]] }
  0x72   : > { %1367 = vmatmul.msk.f32.vlgmr.msrb.gmra.mxu1 %vm314_vm0, %v650_v30  ;;  %v2666_v4 = vstv %s2710_s5  ;;  %s2715_s5 = sld [smem:[#allocation33_spill]] }
  0x73   : > { %s1980_s22 = sld [smem:[#allocation5 + $0x25]] }
  0x74   : > { %s1982_s4 = sld [smem:[#allocation5 + $0x3a]] }
  0x75   : > { %v947_v23 = vstv %s2714_s28  ;;  %s1990_s27 = sld [smem:[#allocation5 + $0x3b]] }
  0x76   : > { %1372 = vmatmul.msk.f32.gmra.mxu3 %vm314_vm0, %v651_v34  ;;  %2716 = sst [smem:[#allocation30_spill]] %s1961_s24 }
  0x77   : > { %s2004_s16 = sld [smem:[#allocation5 + $0x36]] }
  0x78   : > { %v835_v25 = vstv %s2715_s5  ;;  %s2012_s5 = sld [smem:[#allocation5 + $0x37]] }
  0x79   : > { %1370 = vmatmul.msk.f32.gmra.mxu2 %vm314_vm0, %v653_v35  ;;  %1366 = vmatmul.msk.f32.gmra.mxu0 %vm314_vm0, %v653_v35  ;;  %2718 = sst [smem:[#allocation18_spill]] %s1980_s22 }
  0x7a   : > { %1368 = vmatmul.msk.f32.gmra.mxu1 %vm314_vm0, %v651_v34  ;;  %s2035_s29 = sld [smem:[#allocation5 + $0x32]] }
  0x7b   : > { %s2042_s7 = sld [smem:[#allocation5 + $0x33]] }
  0x7c   : > { %s2052_s30 = sld [smem:[#allocation5 + $0x3e]] }
  0x7d   : > { %s2063_s20 = sld [smem:[#allocation5 + $0x3f]] }
  0x7e   : > { %s2720_s11 = sld [smem:[#allocation26_spill]] }
  0x7f   : > { %s2071_s12 = sld [smem:[#allocation6 + $0x2]] }
  0x80   : > { %s2084_s17 = sld [smem:[#allocation6 + $0x1]] }
  0x81   : > { %s2096_s24 = sld [smem:[#allocation6]] }
  0x82   : > { %s2108_s28 = sld [smem:[#allocation6 + $0x3]] }
  0x83   : > { %s2143_s10 = sld [smem:[#allocation5 + $0x38]] }
  0x84   : > { %s2151_s15 = sld [smem:[#allocation5 + $0x39]] }
  0x85   : > { %s2727_s13 = sld [smem:[#allocation27_spill]] }
  0x86   : > { %s2185_s0 = sld [smem:[#allocation5 + $0x34]] }
  0x87   : > { %s2196_s2 = sld [smem:[#allocation5 + $0x35]] }
  0x88   : > { %s2218_s22 = sld [smem:[#allocation5 + $0x20]] }
  0x89   : > { %s2728_s3 = sld [smem:[#allocation29_spill]] }
  0x8a   : > { %s2734_s18 = sld [smem:[#allocation18_spill]] }
  0x8b   : > { %s2287_s25 = sld [smem:[#allocation5 + $0x30]] }
  0x8c   : > { %s2294_s6 = sld [smem:[#allocation5 + $0x31]] }
  0x8d   : > { %s2417_s1 = sld [smem:[#allocation5 + $0xc]] }
  0x8e   : > { %s2764_s21 = sld [smem:[#allocation28_spill]] }
  0x8f   : > { %s2493_s23 = sld [smem:[#allocation5 + $0x1d]] }
  0x90   : > { %s2506_s8 = sld [smem:[#allocation5 + $0x2d]] }
  0xbe   : > { %v338_v36 = vpop.f32.mrf.mxu0 }
  0xbf   : > { %v367_v37 = vpop.f32.mrf.mxu1 }
  0xc0   : > { %v1917_v52 = vadd.f32 %v367_v37, %v338_v36 }
  0xc1   : > { %v413_v47 = vpop.f32.mrf.mxu3 }
  0xc2   : > { %v1033_v7 = vmul.f32 %v1032_v38, %v1917_v52  ;;  %v922_v8 = vmul.f32 %v921_v40, %v1917_v52  ;;  %v810_v9 = vmul.f32 %v809_v42, %v1917_v52  ;;  %v1144_v14 = vmul.f32 %v1143_v44, %v1917_v52 }
  0xc3   : > { %v983_v16 = vmul.f32 %v982_v46, %v1917_v52  ;;  %v872_v17 = vmul.f32 %v871_v49, %v1917_v52  ;;  %v760_v18 = vmul.f32 %v2663_v51, %v1917_v52 }
  0xc4   : > { %v390_v56 = vpop.f32.mrf.mxu2 }
  0xc5   : > { %v1928_v61 = vadd.f32 %v413_v47, %v390_v56 }
  0xc6   : > { %v341_v1 = vpop.f32.mrf.mxu0 }
  0xc7   : > { %v370_v6 = vpop.f32.mrf.mxu1  ;;  %v1037_v11 = vmul.f32 %v1036_v39, %v1928_v61  ;;  %v926_v12 = vmul.f32 %v925_v41, %v1928_v61  ;;  %v814_v13 = vmul.f32 %v813_v43, %v1928_v61  ;;  %v1148_v32 = vmul.f32 %v1147_v45, %v1928_v61 }
  0xc8   : > { %v1963_v15 = vadd.f32 %v370_v6, %v341_v1  ;;  %v987_v36 = vmul.f32 %v986_v48, %v1928_v61 }
  0xc9   : > { %v416_v19 = vpop.f32.mrf.mxu3  ;;  %v1988_v29 = vadd.f32 %v1037_v11, %v1033_v7  ;;  %v1992_v30 = vadd.f32 %v926_v12, %v922_v8  ;;  %v1994_v31 = vadd.f32 %v814_v13, %v810_v9  ;;  %v2047_v9 = vadd.f32 %v1148_v32, %v1144_v14 }
  0xca   : > { %v1034_v34 = vmul.f32 %v1032_v38, %v1963_v15  ;;  %v923_v35 = vmul.f32 %v921_v40, %v1963_v15  ;;  %v811_v47 = vmul.f32 %v809_v42, %v1963_v15  ;;  %v1145_v56 = vmul.f32 %v1143_v44, %v1963_v15 }
  0xcb   : > { %v876_v38 = vmul.f32 %v875_v50, %v1928_v61  ;;  %v764_v40 = vmul.f32 %v763_v55, %v1928_v61  ;;  %v984_v44 = vmul.f32 %v982_v46, %v1963_v15  ;;  %v1004_v11 = vstv %s1946_s14  ;;  %s2498_s14 = sld [smem:[#allocation5 + $0x2c]] }
  0xcc   : > { %v393_v28 = vpop.f32.mrf.mxu2  ;;  %v2061_v46 = vmul.f32 %v871_v49, %v1963_v15  ;;  %v2668_v14 = vstv %s1971_s19 }
  0xcd   : > { %v1999_v33 = vadd.f32 %v416_v19, %v393_v28 }
  0xce   : > { %v451_v37 = vpop.f32.mrf.mxu0 }
  0xcf   : > { %v480_v1 = vpop.f32.mrf.mxu1  ;;  %v1038_v6 = vmul.f32 %v1036_v39, %v1999_v33  ;;  %v927_v7 = vmul.f32 %v925_v41, %v1999_v33  ;;  %v815_v42 = vmul.f32 %v813_v43, %v1999_v33  ;;  %v1149_v39 = vmul.f32 %v1147_v45, %v1999_v33 }
  0xd0   : > { %v2040_v8 = vadd.f32 %v480_v1, %v451_v37  ;;  %v988_v41 = vmul.f32 %v986_v48, %v1999_v33  ;;  %v2054_v43 = vadd.f32 %v987_v36, %v983_v16  ;;  %v2065_v45 = vadd.f32 %v876_v38, %v872_v17 }
  0xd1   : > { %v526_v13 = vpop.f32.mrf.mxu3  ;;  %v2069_v16 = vadd.f32 %v764_v40, %v760_v18  ;;  %v2073_v19 = vadd.f32 %v1038_v6, %v1034_v34  ;;  %v2075_v49 = vadd.f32 %v927_v7, %v923_v35  ;;  %v2077_v28 = vadd.f32 %v815_v42, %v811_v47 }
  0xd2   : > { %v2079_v32 = vadd.f32 %v988_v41, %v984_v44  ;;  %v1043_v18 = vmul.f32 %v1042_v53, %v2040_v8  ;;  %v932_v34 = vmul.f32 %v931_v57, %v2040_v8  ;;  %v820_v35 = vmul.f32 %v819_v59, %v2040_v8 }
  0xd3   : > { %v2092_v36 = vadd.f32 %v1149_v39, %v1145_v56  ;;  %v1154_v47 = vmul.f32 %v1153_v62, %v2040_v8  ;;  %v993_v38 = vmul.f32 %v992_v0, %v2040_v8  ;;  %v882_v40 = vmul.f32 %v2665_v3, %v2040_v8 }
  0xd4   : > { %v503_v17 = vpop.f32.mrf.mxu2  ;;  %v2113_v6 = vmul.f32 %v2664_v5, %v2040_v8  ;;  %v2118_v7 = vmul.f32 %v875_v50, %v1999_v33  ;;  %v2123_v42 = vmul.f32 %v763_v55, %v1999_v33 }
  0xd5   : > { %v2094_v37 = vadd.f32 %v526_v13, %v503_v17 }
  0xd6   : > { %v454_v1 = vpop.f32.mrf.mxu0 }
  0xd7   : > { %v483_v44 = vpop.f32.mrf.mxu1  ;;  %v1047_v39 = vmul.f32 %v1046_v54, %v2094_v37  ;;  %v936_v13 = vmul.f32 %v935_v58, %v2094_v37  ;;  %v824_v50 = vmul.f32 %v823_v60, %v2094_v37  ;;  %v1158_v41 = vmul.f32 %v1157_v63, %v2094_v37 }
  0xd8   : > { %v2135_v17 = vadd.f32 %v483_v44, %v454_v1 }
  0xd9   : > { %v1049_v56 = vadd.f32 %v1047_v39, %v1043_v18  ;;  %v938_v3 = vadd.f32 %v936_v13, %v932_v34  ;;  %v826_v48 = vadd.f32 %v824_v50, %v820_v35  ;;  %v529_v12 = vpop.f32.mrf.mxu3  ;;  %v1160_v39 = vadd.f32 %v1158_v41, %v1154_v47 }
  0xda   : > { %v1044_v1 = vmul.f32 %v1042_v53, %v2135_v17  ;;  %v933_v18 = vmul.f32 %v931_v57, %v2135_v17  ;;  %v821_v34 = vmul.f32 %v819_v59, %v2135_v17  ;;  %v1155_v35 = vmul.f32 %v1153_v62, %v2135_v17 }
  0xdb   : > { %v2163_v13 = vadd.f32 %v1049_v56, %v1988_v29  ;;  %v2166_v50 = vadd.f32 %v938_v3, %v1992_v30  ;;  %v2169_v51 = vadd.f32 %v826_v48, %v1994_v31  ;;  %v997_v57 = vmul.f32 %v996_v2, %v2094_v37 }
  0xdc   : > { %v506_v53 = vpop.f32.mrf.mxu2  ;;  %v2177_v62 = vstv %s2071_s12  ;;  %v2180_v29 = vstv %s2084_s17  ;;  %v2183_v47 = vstv %s2096_s24  ;;  %v2188_v30 = vstv %s2108_s28  ;;  %s2226_s24 = sld [smem:[#allocation5 + $0x21]] }
  0xdd   : > { %v2174_v59 = vadd.f32 %v529_v12, %v506_v53  ;;  %v2191_v31 = vadd.f32 %v1160_v39, %v2047_v9  ;;  %v999_v48 = vadd.f32 %v997_v57, %v993_v38  ;;  %v886_v12 = vmul.f32 %v2666_v4, %v2094_v37  ;;  %s2733_s17 = sld [smem:[#allocation30_spill]] }
  0xde   : > { %v564_v3 = vpop.f32.mrf.mxu0  ;;  %v994_v57 = vmul.f32 %v992_v0, %v2135_v17 }
  0xdf   : > { %v593_v56 = vpop.f32.mrf.mxu1  ;;  %v1048_v41 = vmul.f32 %v1046_v54, %v2174_v59  ;;  %v937_v53 = vmul.f32 %v935_v58, %v2174_v59  ;;  %v825_v9 = vmul.f32 %v823_v60, %v2174_v59  ;;  %v1159_v38 = vmul.f32 %v1157_v63, %v2174_v59 }
  0xe0   : > { %v2210_v39 = vadd.f32 %v593_v56, %v564_v3  ;;  %v998_v54 = vmul.f32 %v996_v2, %v2174_v59  ;;  %v888_v44 = vadd.f32 %v886_v12, %v882_v40  ;;  %v1001_v3 = vadd.f32 %v999_v48, %v2054_v43 }
  0xe1   : > { %v1050_v58 = vadd.f32 %v1048_v41, %v1044_v1  ;;  %v939_v55 = vadd.f32 %v937_v53, %v933_v18  ;;  %v827_v5 = vadd.f32 %v825_v9, %v821_v34  ;;  %v1161_v4 = vadd.f32 %v1159_v38, %v1155_v35  ;;  %v639_v60 = vpop.f32.mrf.mxu3 }
  0xe2   : > { %v1055_v63 = vmul.f32 %v1054_v20, %v2210_v39  ;;  %v944_v2 = vmul.f32 %v943_v22, %v2210_v39  ;;  %v832_v40 = vmul.f32 %v831_v24, %v2210_v39  ;;  %v1166_v43 = vmul.f32 %v1165_v26, %v2210_v39 }
  0xe3   : > { %v2235_v1 = vadd.f32 %v1050_v58, %v2073_v19  ;;  %v2241_v34 = vadd.f32 %v939_v55, %v2075_v49  ;;  %v2244_v35 = vadd.f32 %v827_v5, %v2077_v28  ;;  %v2247_v48 = vadd.f32 %v1161_v4, %v2092_v36 }
  0xe4   : > { %v616_v18 = vpop.f32.mrf.mxu2  ;;  %v1000_v12 = vadd.f32 %v998_v54, %v994_v57  ;;  %v1005_v41 = vmul.f32 %v1004_v11, %v2210_v39  ;;  %v890_v53 = vadd.f32 %v888_v44, %v2065_v45  ;;  %v774_v49 = vmul.f32 %v2667_v10, %v2094_v37 }
  0xe5   : > { %v2249_v19 = vadd.f32 %v639_v60, %v616_v18  ;;  %v894_v4 = vmul.f32 %v2668_v14, %v2210_v39  ;;  %v2735_v54 = vstv %s2733_s17  ;;  %v2736_v60 = vstv %s2734_s18 }
  0xe6   : > { %v567_v55 = vpop.f32.mrf.mxu0  ;;  %v2259_v5 = vadd.f32 %v1000_v12, %v2079_v32  ;;  %v776_v12 = vadd.f32 %v774_v49, %v2113_v6 }
  0xe7   : > { %v596_v9 = vpop.f32.mrf.mxu1  ;;  %v1059_v38 = vmul.f32 %v1058_v21, %v2249_v19  ;;  %v948_v45 = vmul.f32 %v947_v23, %v2249_v19  ;;  %v836_v44 = vmul.f32 %v835_v25, %v2249_v19  ;;  %v1170_v32 = vmul.f32 %v1169_v27, %v2249_v19 }
  0xe8   : > { %v2278_v57 = vadd.f32 %v596_v9, %v567_v55  ;;  %v1009_v58 = vmul.f32 %v2735_v54, %v2249_v19  ;;  %v898_v18 = vmul.f32 %v2736_v60, %v2249_v19  ;;  %v781_v9 = vstv %s2218_s22 }
  0xe9   : > { %v1061_v10 = vadd.f32 %v1059_v38, %v1055_v63  ;;  %v950_v36 = vadd.f32 %v948_v45, %v944_v2  ;;  %v838_v56 = vadd.f32 %v836_v44, %v832_v40  ;;  %v1172_v14 = vadd.f32 %v1170_v32, %v1166_v43  ;;  %v642_v28 = vpop.f32.mrf.mxu3 }
  0xea   : > { %v1056_v55 = vmul.f32 %v1054_v20, %v2278_v57  ;;  %v2670_v54 = vstv %s2226_s24  ;;  %v2737_v60 = vstv %s2720_s11  ;;  %v945_v63 = vmul.f32 %v943_v22, %v2278_v57 }
  0xeb   : > { %v883_v0 = vmul.f32 %v2737_v60, %v2135_v17  ;;  %v2300_v6 = vadd.f32 %v1061_v10, %v2163_v13  ;;  %v833_v2 = vmul.f32 %v831_v24, %v2278_v57  ;;  %v1167_v20 = vmul.f32 %v1165_v26, %v2278_v57 }
  0xec   : > { %v619_v40 = vpop.f32.mrf.mxu2  ;;  %v2312_v43 = vadd.f32 %v950_v36, %v2166_v50  ;;  %v2315_v10 = vadd.f32 %v838_v56, %v2169_v51  ;;  %v1011_v13 = vadd.f32 %v1009_v58, %v1005_v41  ;;  %v900_v22 = vadd.f32 %v898_v18, %v894_v4 }
  0xed   : > { %v2317_v49 = vadd.f32 %v642_v28, %v619_v40  ;;  %v2320_v24 = vadd.f32 %v1172_v14, %v2191_v31  ;;  %v1006_v26 = vmul.f32 %v1004_v11, %v2278_v57  ;;  %v778_v50 = vadd.f32 %v776_v12, %v2069_v16 }
  0xee   : > { %v677_v36 = vpop.f32.mrf.mxu0  ;;  %v2326_v38 = vadd.f32 %v1011_v13, %v1001_v3  ;;  %v2328_v51 = vadd.f32 %v900_v22, %v890_v53  ;;  %v782_v56 = vmul.f32 %v781_v9, %v2210_v39  ;;  %v786_v41 = vmul.f32 %v2670_v54, %v2249_v19 }
  0xef   : > { %v706_v14 = vpop.f32.mrf.mxu1  ;;  %v1060_v11 = vmul.f32 %v1058_v21, %v2317_v49  ;;  %v949_v16 = vmul.f32 %v947_v23, %v2317_v49  ;;  %v837_v31 = vmul.f32 %v835_v25, %v2317_v49  ;;  %v1171_v3 = vmul.f32 %v1169_v27, %v2317_v49 }
  0xf0   : > { %v2348_v53 = vadd.f32 %v706_v14, %v677_v36  ;;  %v2738_v4 = vstv %s2733_s17  ;;  %v2669_v45 = vstv %s2287_s25  ;;  %v2739_v44 = vstv %s2727_s13 }
  0xf1   : > { %v1010_v28 = vmul.f32 %v2738_v4, %v2317_v49  ;;  %v887_v21 = vmul.f32 %v2739_v44, %v2174_v59  ;;  %v1062_v32 = vadd.f32 %v1060_v11, %v1056_v55  ;;  %v951_v58 = vadd.f32 %v949_v16, %v945_v63  ;;  %v752_v25 = vpop.f32.mrf.mxu3 }
  0xf2   : > { %v839_v23 = vadd.f32 %v837_v31, %v833_v2  ;;  %v1173_v18 = vadd.f32 %v1171_v3, %v1167_v20  ;;  %v2740_v12 = vstv %s1982_s4  ;;  %v2741_v60 = vstv %s2004_s16 }
  0xf3   : > { %v1067_v27 = vmul.f32 %v2740_v12, %v2348_v53  ;;  %v956_v40 = vmul.f32 %v2741_v60, %v2348_v53  ;;  %v2742_v13 = vstv %s2035_s29  ;;  %v2671_v36 = vstv %s2294_s6 }
  0xf4   : > { %v844_v22 = vmul.f32 %v2742_v13, %v2348_v53  ;;  %v2368_v14 = vadd.f32 %v1062_v32, %v2235_v1  ;;  %v2371_v55 = vadd.f32 %v951_v58, %v2241_v34  ;;  %v2374_v63 = vadd.f32 %v839_v23, %v2244_v35  ;;  %v729_v11 = vpop.f32.mrf.mxu2 }
  0xf5   : > { %v2743_v2 = vstv %s2052_s30  ;;  %v2380_v16 = vadd.f32 %v1173_v18, %v2247_v48  ;;  %v2744_v31 = vstv %s2143_s10  ;;  %v1012_v3 = vadd.f32 %v1010_v28, %v1006_v26 }
  0xf6   : > { %v1178_v20 = vmul.f32 %v2743_v2, %v2348_v53  ;;  %v1017_v1 = vmul.f32 %v2744_v31, %v2348_v53  ;;  %v788_v34 = vadd.f32 %v786_v41, %v782_v56  ;;  %v2385_v4 = vadd.f32 %v752_v25, %v729_v11  ;;  %v680_v58 = vpop.f32.mrf.mxu0 }
  0xf7   : > { %v2745_v35 = vstv %s2185_s0  ;;  %v794_v32 = vmul.f32 %v2669_v45, %v2348_v53  ;;  %v2393_v48 = vadd.f32 %v887_v21, %v883_v0  ;;  %v2396_v23 = vadd.f32 %v1012_v3, %v2259_v5  ;;  %v709_v28 = vpop.f32.mrf.mxu1 }
  0xf8   : > { %v906_v44 = vmul.f32 %v2745_v35, %v2348_v53  ;;  %v790_v18 = vadd.f32 %v788_v34, %v778_v50  ;;  %v2746_v26 = vstv %s1971_s19  ;;  %v2403_v41 = vadd.f32 %v2118_v7, %v2061_v46  ;;  %s2473_s19 = sld [smem:[#allocation5 + $0xd]] }
  0xf9   : > { %v895_v56 = vmul.f32 %v2746_v26, %v2278_v57  ;;  %v2747_v25 = vstv %s1990_s27  ;;  %v2748_v0 = vstv %s2012_s5  ;;  %v2749_v5 = vstv %s2042_s7 }
  0xfa   : > { %v1071_v12 = vmul.f32 %v2747_v25, %v2385_v4  ;;  %v960_v21 = vmul.f32 %v2748_v0, %v2385_v4  ;;  %v848_v50 = vmul.f32 %v2749_v5, %v2385_v4  ;;  %v2750_v60 = vstv %s2063_s20  ;;  %v755_v0 = vpop.f32.mrf.mxu3 }
  0xfb   : > { %v1182_v13 = vmul.f32 %v2750_v60, %v2385_v4  ;;  %v2419_v46 = vadd.f32 %v709_v28, %v680_v58  ;;  %v2751_v7 = vstv %s2151_s15  ;;  %v2752_v11 = vstv %s2196_s2 }
  0xfc   : > { %v1021_v2 = vmul.f32 %v2751_v7, %v2385_v4  ;;  %v910_v31 = vmul.f32 %v2752_v11, %v2385_v4  ;;  %v798_v3 = vmul.f32 %v2671_v36, %v2385_v4  ;;  %v1073_v34 = vadd.f32 %v1071_v12, %v1067_v27  ;;  %v732_v12 = vpop.f32.mrf.mxu2 }
  0xfd   : > { %v962_v35 = vadd.f32 %v960_v21, %v956_v40  ;;  %v850_v26 = vadd.f32 %v848_v50, %v844_v22  ;;  %v1184_v25 = vadd.f32 %v1182_v13, %v1178_v20  ;;  %v2753_v5 = vstv %s1982_s4  ;;  %s1652_s4 = smov 32  }
  0xfe   : > { %v1068_v60 = vmul.f32 %v2753_v5, %v2419_v46  ;;  %v2754_v58 = vstv %s2004_s16  ;;  %v2755_v45 = vstv %s2035_s29  ;;  %v2756_v54 = vstv %s2734_s18  ;;  %s2768_s16 = sld [smem:[#allocation19_spill]] }
  0xff   : > { %v957_v28 = vmul.f32 %v2754_v58, %v2419_v46  ;;  %v845_v7 = vmul.f32 %v2755_v45, %v2419_v46  ;;  %v899_v11 = vmul.f32 %v2756_v54, %v2317_v49  ;;  %v1075_v36 = vadd.f32 %v1073_v34, %v2300_v6  ;;  %s1433_s29 = sld [smem:[#allocation5 + $0x3d]] }
 0x100   : > { %v964_v27 = vadd.f32 %v962_v35, %v2312_v43  ;;  %v852_v40 = vadd.f32 %v850_v26, %v2315_v10  ;;  %v2757_v22 = vstv %s2052_s30  ;;  %v2449_v21 = vadd.f32 %v1184_v25, %v2320_v24 }
 0x101   : > { %v1179_v20 = vmul.f32 %v2757_v22, %v2419_v46  ;;  %v1023_v45 = vadd.f32 %v1021_v2, %v1017_v1  ;;  %v912_v50 = vadd.f32 %v910_v31, %v906_v44  ;;  %v800_v54 = vadd.f32 %v798_v3, %v794_v32 }
 0x102   : > { %v2451_v13 = vadd.f32 %v755_v0, %v732_v12  ;;  %v1077_v6 = vadd.f32 %v1075_v36, %v2177_v62  ;;  %v966_v43 = vadd.f32 %v964_v27, %v2180_v29  ;;  %v854_v10 = vadd.f32 %v852_v40, %v2183_v47 }
 0x103   : > { %v1025_v34 = vadd.f32 %v1023_v45, %v2326_v38  ;;  %v2758_v24 = vstv %s2143_s10  ;;  %v914_v1 = vadd.f32 %v912_v50, %v2328_v51  ;;  %v802_v44 = vadd.f32 %v800_v54, %v790_v18 }
 0x104   : > { %v1018_v35 = vmul.f32 %v2758_v24, %v2419_v46  ;;  %v2759_v32 = vstv %s1990_s27  ;;  %1081 = vrot.lane.b32.xlu2 %v1077_v6, %s1652_s4  ;;  %v2760_v36 = vstv %s2012_s5  ;;  %970 = vrot.lane.b32.xlu1 %v966_v43, %s1652_s4  ;;  %s2488_s5 = sld [smem:[#allocation5 + $0x1c]]  ;;  %v901_v54 = vadd.f32 %v899_v11, %v895_v56 }
 0x105   : > { %v1072_v2 = vmul.f32 %v2759_v32, %v2451_v13  ;;  %v961_v31 = vmul.f32 %v2760_v36, %v2451_v13  ;;  %v2761_v3 = vstv %s2042_s7  ;;  %v1093_v26 = vstv %s2417_s1  ;;  %858 = vrot.lane.b32.xlu0 %v854_v10, %s1652_s4  ;;  %s1432_s27 = sld [smem:[#allocation5 + $0x3c]] }
 0x106   : > { %v849_v38 = vmul.f32 %v2761_v3, %v2451_v13  ;;  %v2762_v51 = vstv %s2063_s20  ;;  %v2480_v25 = vadd.f32 %v2177_v62, %v1025_v34  ;;  %v2763_v0 = vstv %s2151_s15  ;;  %s2774_s7 = sld [smem:[#allocation13_spill]] }
 0x107   : > { %v1183_v18 = vmul.f32 %v2762_v51, %v2451_v13  ;;  %v1022_v5 = vmul.f32 %v2763_v0, %v2451_v13  ;;  %v2486_v58 = vadd.f32 %v2180_v29, %v914_v1  ;;  %v1074_v27 = vadd.f32 %v1072_v2, %v1068_v60  ;;  %s2775_s15 = sld [smem:[#allocation40_spill]] }
 0x108   : > { %v963_v40 = vadd.f32 %v961_v31, %v957_v28  ;;  %v851_v22 = vadd.f32 %v849_v38, %v845_v7  ;;  %v2491_v12 = vadd.f32 %v2183_v47, %v802_v44  ;;  %v2765_v6 = vstv %s2185_s0 }
 0x109   : > { %v1185_v45 = vadd.f32 %v1183_v18, %v1179_v20  ;;  %v1024_v50 = vadd.f32 %v1022_v5, %v1018_v35  ;;  %v907_v43 = vmul.f32 %v2765_v6, %v2419_v46  ;;  %v1076_v10 = vadd.f32 %v1074_v27, %v2368_v14 }
 0x10a   : > { %v965_v60 = vadd.f32 %v963_v40, %v2371_v55  ;;  %v853_v28 = vadd.f32 %v851_v22, %v2374_v63  ;;  %v2766_v7 = vstv %s2196_s2  ;;  %v891_v14 = vadd.f32 %v2393_v48, %v2403_v41 }
 0x10b   : > { %v911_v34 = vmul.f32 %v2766_v7, %v2451_v13  ;;  %v1187_v56 = vadd.f32 %v1185_v45, %v2380_v16  ;;  %v1026_v11 = vadd.f32 %v1024_v50, %v2396_v23  ;;  %v2767_v55 = vstv %s2764_s21 }
 0x10c   : > { %v771_v20 = vmul.f32 %v2767_v55, %v2135_v17  ;;  %v1078_v63 = vadd.f32 %v1076_v10, %v2177_v62  ;;  %v967_v24 = vadd.f32 %v965_v60, %v2180_v29  ;;  %v855_v35 = vadd.f32 %v853_v28, %v2183_v47  ;;  %p293_p1 = scmp.lt.s32.totalorder %s2774_s7, 1 }
 0x10d   : > { %v913_v1 = vadd.f32 %v911_v34, %v907_v43  ;;  %v1189_v16 = vadd.f32 %v1187_v56, %v2188_v30  ;;  %v2520_v23 = vadd.f32 %v2177_v62, %v1026_v11  ;;  %v903_v44 = vadd.f32 %v901_v54, %v891_v14 }
 0x10e   : > { %v2769_v48 = vstv %s2728_s3  ;;  %1083 = vrot.lane.b32.xlu2 %v1078_v63, %s1652_s4  ;;  %972 = vrot.lane.b32.xlu1 %v967_v24, %s1652_s4  ;;  %v783_v32 = vmul.f32 %v781_v9, %v2278_v57  ;;  %v2770_v2 = vstv %s2226_s24  ;;  %v1095_v40 = vmul.f32 %v1093_v26, %v1963_v15  ;;  %s2785_s7 = smov (!%p293_p1, %s2774_s7), 1 }
 0x10f   : > { %v775_v41 = vmul.f32 %v2769_v48, %v2174_v59  ;;  %v787_v36 = vmul.f32 %v2770_v2, %v2317_v49  ;;  %v2771_v31 = vstv %s2287_s25  ;;  %v1097_v62 = vstv %s2473_s19  ;;  %860 = vrot.lane.b32.xlu0 %v855_v35, %s1652_s4  ;;  %s1448_s30 = sshll.u32 %s2785_s7, 6 }
 0x110   : > { %v795_v3 = vmul.f32 %v2771_v31, %v2419_v46  ;;  %v915_v38 = vadd.f32 %v913_v1, %v903_v44  ;;  %v2772_v18 = vstv %s2294_s6  ;;  %v2773_v5 = vstv %s2768_s16  ;;  %s300_s10 = scalar_lea.vmem %s2775_s15, %s1448_s30 }
 0x111   : > { %v777_v51 = vadd.f32 %v775_v41, %v771_v20  ;;  %v799_v0 = vmul.f32 %v2772_v18, %v2451_v13  ;;  %v761_v9 = vmul.f32 %v2773_v5, %v1963_v15  ;;  %v789_v27 = vadd.f32 %v787_v36, %v783_v32 }
 0x112   : > { %v1099_v22 = vmul.f32 %v1097_v62, %v1999_v33  ;;  %v1103_v45 = vstv %s2488_s5  ;;  %v2548_v50 = vadd.f32 %v2180_v29, %v915_v38  ;;  %v1107_v60 = vstv %s2493_s23 }
 0x113   : > { %v801_v54 = vadd.f32 %v799_v0, %v795_v3  ;;  %v767_v6 = vadd.f32 %v2123_v42, %v761_v9  ;;  %v1105_v43 = vmul.f32 %v1103_v45, %v2135_v17  ;;  %v1115_v28 = vstv %s2498_s14 }
 0x114   : > { %v1101_v10 = vadd.f32 %v1099_v22, %v1095_v40  ;;  %v1119_v7 = vstv %s2506_s8  ;;  %v1109_v56 = vmul.f32 %v1107_v60, %v2174_v59  ;;  %v1094_v15 = vmul.f32 %v1093_v26, %v1917_v52 }
 0x115   : > { %v779_v34 = vadd.f32 %v777_v51, %v767_v6  ;;  %v1098_v33 = vmul.f32 %v1097_v62, %v1928_v61  ;;  %v1104_v11 = vmul.f32 %v1103_v45, %v2040_v8  ;;  %v1108_v29 = vmul.f32 %v1107_v60, %v2094_v37 }
 0x116   : > { %v1116_v14 = vmul.f32 %v1115_v28, %v2210_v39  ;;  %v1120_v42 = vmul.f32 %v1119_v7, %v2249_v19  ;;  %v1188_v17 = vadd.f32 %v2449_v21, %v2188_v30  ;;  %v1111_v20 = vadd.f32 %v1109_v56, %v1105_v43  ;;  %1194 = vrot.lane.b32.xlu1 %v1189_v16, %s1652_s4 }
 0x117   : > { %v791_v55 = vadd.f32 %v789_v27, %v779_v34  ;;  %v1100_v59 = vadd.f32 %v1098_v33, %v1094_v15  ;;  %v1110_v63 = vadd.f32 %v1108_v29, %v1104_v11  ;;  %v1117_v8 = vmul.f32 %v1115_v28, %v2278_v57 }
 0x118   : > { %v1122_v52 = vadd.f32 %v1120_v42, %v1116_v14  ;;  %1192 = vrot.lane.b32.xlu0 %v1188_v17, %s1652_s4  ;;  %v1113_v61 = vadd.f32 %v1111_v20, %v1101_v10  ;;  %v1121_v37 = vmul.f32 %v1119_v7, %v2317_v49  ;;  %v1127_v24 = vstv %s1432_s27 }
 0x119   : > { %v1112_v39 = vadd.f32 %v1110_v63, %v1100_v59  ;;  %v1131_v35 = vstv %s1433_s29  ;;  %v803_v1 = vadd.f32 %v801_v54, %v791_v55  ;;  %v1128_v16 = vmul.f32 %v1127_v24, %v2348_v53 }
 0x11a   : > { %v1123_v19 = vadd.f32 %v1121_v37, %v1117_v8  ;;  %v1132_v44 = vmul.f32 %v1131_v35, %v2385_v4  ;;  %v1129_v49 = vmul.f32 %v1127_v24, %v2419_v46  ;;  %v1133_v41 = vmul.f32 %v1131_v35, %v2451_v13 }
 0x11b   : > { %v1124_v26 = vadd.f32 %v1122_v52, %v1112_v39  ;;  %v807_v48 = vadd.f32 %v2183_v47, %v803_v1 }
 0x11c   : > { %v1125_v21 = vadd.f32 %v1123_v19, %v1113_v61  ;;  %v1134_v57 = vadd.f32 %v1132_v44, %v1128_v16  ;;  %v1135_v2 = vadd.f32 %v1133_v41, %v1129_v49 }
 0x11e   : > { %v1136_v32 = vadd.f32 %v1134_v57, %v1124_v26  ;;  %v1137_v31 = vadd.f32 %v1135_v2, %v1125_v21 }
 0x120   : > { %v1140_v36 = vadd.f32 %v2188_v30, %v1136_v32  ;;  %v1141_v3 = vadd.f32 %v2188_v30, %v1137_v31 }
 0x15e   : > { %v1082_v47 = vpop.permute.xlu2 %1081 }
 0x15f   : > { %v1087_v53 = vsel %vm864_vm1, %v2480_v25, %v1082_v47 }
 0x160   : > { %1424 = vst.msk [vmem:[%s300_s10 + $0x20] sm:$0xff] %vm867_vm2, %v1087_v53 }
 0x168   : > { %v1084_v4 = vpop.permute.xlu2 %1083 }
 0x169   : > { %v1088_v46 = vsel %vm864_vm1, %v2520_v23, %v1084_v4 }
 0x16a   : > { %1425 = vst.msk [vmem:[%s300_s10 + $0x28] sm:$0xff] %vm867_vm2, %v1088_v46 }
 0x176   : > { %v971_v30 = vpop.permute.xlu1 %970 }
 0x177   : > { %v976_v13 = vsel %vm864_vm1, %v2486_v58, %v971_v30  ;;  %v859_v62 = vpop.permute.xlu0 %858 }
 0x178   : > { %1405 = vst.msk [vmem:[%s300_s10 + $0x10] sm:$0xff] %vm867_vm2, %v976_v13  ;;  %v865_v38 = vsel %vm864_vm1, %v2491_v12, %v859_v62 }
 0x179   : > { %868 = vst.msk [vmem:[%s300_s10] sm:$0xff] %vm867_vm2, %v865_v38 }
 0x180   : > { %v973_v25 = vpop.permute.xlu1 %972 }
 0x181   : > { %v977_v51 = vsel %vm864_vm1, %v2548_v50, %v973_v25  ;;  %v861_v18 = vpop.permute.xlu0 %860 }
 0x182   : > { %1406 = vst.msk [vmem:[%s300_s10 + $0x18] sm:$0xff] %vm867_vm2, %v977_v51  ;;  %v866_v23 = vsel %vm864_vm1, %v807_v48, %v861_v18 }
 0x183   : > { %869 = vst.msk [vmem:[%s300_s10 + $0x8] sm:$0xff] %vm867_vm2, %v866_v23 }
 0x188   : > { %v1195_v58 = vpop.permute.xlu1 %1194 }
 0x189   : > { %v1199_v0 = vsel %vm864_vm1, %v1141_v3, %v1195_v58 }
 0x18a   : > { %v1193_v5 = vpop.permute.xlu0 %1192  ;;  %1444 = vst.msk [vmem:[%s300_s10 + $0x38] sm:$0xff] %vm867_vm2, %v1199_v0 }
 0x18b   : > { %v1198_v12 = vsel %vm864_vm1, %v1140_v36, %v1193_v5 }
 0x18c   : > { %1443 = vst.msk [vmem:[%s300_s10 + $0x30] sm:$0xff] %vm867_vm2, %v1198_v12 }
 0x18d PF: > { %s2776_s13 = sld [smem:[#allocation15_spill]] }
 0x18e   : > { %s2777_s18 = sld [smem:[#allocation11_spill]] }
 0x18f   : > { %s2778_s19 = sld [smem:[#allocation12_spill]] }
 0x190   : > { %s2779_s20 = sld [smem:[#allocation17_spill]] }
 0x191   : > { %s2780_s21 = sld [smem:[#allocation14_spill]] }
 0x192   : > { %s2781_s22 = sld [smem:[#allocation16_spill]] }
 0x193   : > { %s20_s23 = sadd.s32 1, %s2776_s13  }
 0x194   : > { %p17_p2 = scmp.ge.s32.totalorder %s20_s23, 4  }
 0x196   :  { %19 = sbr.rel (!%p17_p2) target bundleno = 13 (0xd), region = 95 }
 0x19b   :  { %1233 = vsyncpa [#allocation3], 1 }
 0x19c   :  { %1235 = vsyncpa [#allocation3 + $0x1], 1 }
 0x19d   :  { %1236 = vsyncpa [#allocation4], 1 }
 0x19e   :  { %1238 = vsyncpa [#allocation4 + $0x1], 1 }
 0x19f   :  { %1239 = vsyncpa [#allocation7], 1 }

</bundles_post_ra>
